<compile_context>
chip_gen: v7x
topology: tpu7x:2x2x1
jax: 0.10.0
libtpu: 0.0.40
codegen_flags: <defaults>
</compile_context>

<pallas_src>
import functools

import jax
import jax.numpy as jnp
from jax.experimental import pallas as pl
from jax.experimental.pallas import tpu as pltpu

MASK_SCALE = 1e30           # additive magnitude for masked (non-edge) logits
MXU_DTYPE = jnp.bfloat16    # MXU feed dtype (accumulation stays f32)


def _mxu_dot(a, b):
    """Matmul with bf16 MXU feed and f32 accumulation (no-op cast if already bf16)."""
    return jnp.dot(a.astype(MXU_DTYPE), b.astype(MXU_DTYPE),
                   preferred_element_type=jnp.float32)


def _simple_gat_kernel(x_ref, adj_ref,
                       w0_ref, am0_ref, b0_ref,
                       w1_ref, am1_ref, b1_ref,
                       w2_ref, am2_ref, b2_ref,
                       wl1_ref, bl1_ref, wl2_ref, bl2_ref,
                       o_ref, *, heads, f_out, n_nodes):
    # Edge mask, hoisted once for the whole network. adj arrives as int8; expand to an
    # f32-layout compare so the i1 mask matches the f32 logits' vreg layout.
    adj_mask = adj_ref[...].astype(jnp.float32) > 0.0          # (N, N) bool

    layers = ((w0_ref, am0_ref, b0_ref),
              (w1_ref, am1_ref, b1_ref),
              (w2_ref, am2_ref, b2_ref))

    act = x_ref[...]                                           # (N, Fin), f32
    for w_ref, am_ref, b_ref in layers:
        # Linear projection for all heads at once -> lane-dense (N, H*F) slab.
        h = _mxu_dot(act, w_ref[...])                          # (N, H*F) f32
        h_bf = h.astype(MXU_DTYPE)                             # single bf16 cast/layer

        # Attention coefficients for ALL heads with one small MXU matmul against the
        # block-diagonal (H*F, 2H) packed attention matrix:  e_all = h @ [A_dst | A_src].
        e_all = _mxu_dot(h_bf, am_ref[...])                    # (N, 2H) f32
        e_dst_all = e_all[:, :heads]                           # (N, H)  target side
        e_src_t = e_all[:, heads:].T                           # (H, N)  tiny transpose

        head_outs = []
        for hd in range(heads):                                # static unroll (heads small)
            lo = hd * f_out
            # Edge logits z[i, j] = <h_i, a_dst> + <h_j, a_src> for edge j -> i.
            z = e_dst_all[:, hd:hd + 1] + e_src_t[hd:hd + 1, :]   # (N, N)
            z = jnp.maximum(z, 0.2 * z)                        # LeakyReLU(0.2)
            z = jnp.where(adj_mask, z, -MASK_SCALE)            # mask non-edges
            m = jnp.max(z, axis=-1, keepdims=True)
            p = jnp.exp(z - m)
            alpha = p * pl.reciprocal(jnp.sum(p, axis=-1, keepdims=True),
                                      approx=True)             # softmax over sources
            # Aggregate this head; result stays in registers.
            head_outs.append(_mxu_dot(alpha, h_bf[:, lo:lo + f_out]))  # (N, F)

        # Single full-width register-level concat + bias + fused ReLU per layer.
        slab = jnp.concatenate(head_outs, axis=-1)             # (N, H*F)
        act = jnp.maximum(slab + b_ref[...], 0.0)

    # global_mean_pool (single graph) + lin1 + ReLU + lin2, fused in the same kernel.
    # Plain f32 dots: M=1 matmuls do not benefit from bf16 MXU feeds.
    pooled = jnp.sum(act, axis=0, keepdims=True) * (1.0 / n_nodes)      # (1, H*F)
    h1 = jnp.maximum(
        jnp.dot(pooled, wl1_ref[...], preferred_element_type=jnp.float32)
        + bl1_ref[...], 0.0)
    o_ref[...] = (jnp.dot(h1, wl2_ref[...], preferred_element_type=jnp.float32)
                  + bl2_ref[...])


def _attn_block_matrix(a_dst, a_src, heads, f_out):
    """Pack per-head attention vectors into a block-diagonal (H*F, 2H) matrix so that
    h @ mat yields [e_dst | e_src] for all heads with one matmul."""
    hf = heads * f_out
    mat = jnp.zeros((hf, 2 * heads), jnp.float32)
    for hd in range(heads):
        sl = slice(hd * f_out, (hd + 1) * f_out)
        mat = mat.at[sl, hd].set(a_dst[hd])
        mat = mat.at[sl, heads + hd].set(a_src[hd])
    return mat


def simple_gat_forward(params, x, adj, *, heads, hidden):
    n = x.shape[0]
    out_ch = params['w_lin2'].shape[-1]

    # GATConv(add_self_loops=True): force the diagonal on (int8 adjacency).
    adj_i8 = jnp.maximum(adj.astype(jnp.int8), jnp.eye(n, dtype=jnp.int8))

    kernel = functools.partial(_simple_gat_kernel,
                               heads=heads, f_out=hidden, n_nodes=n)

    args = [x, adj_i8]
    for l in range(3):
        args += [
            params[f'w{l}'].astype(MXU_DTYPE),
            _attn_block_matrix(params[f'adst{l}'], params[f'asrc{l}'],
                               heads, hidden).astype(MXU_DTYPE),
            params[f'b{l}'],
        ]
    args += [params['w_lin1'], params['b_lin1'],
             params['w_lin2'], params['b_lin2']]

    return pl.pallas_call(
        kernel,
        out_shape=jax.ShapeDtypeStruct((1, out_ch), jnp.float32),
        in_specs=[pl.BlockSpec(memory_space=pltpu.MemorySpace.VMEM) for _ in args],
        out_specs=pl.BlockSpec(memory_space=pltpu.MemorySpace.VMEM),
    )(*args)


def simple_gat_reference(params, x, adj, *, heads, hidden):
    """Pure-JAX f32 reference (same math, no bf16 / approx reciprocal)."""
    n = x.shape[0]
    adjf = jnp.maximum(adj.astype(jnp.float32), jnp.eye(n, dtype=jnp.float32))
    act = x
    for l in range(3):
        h = act @ params[f'w{l}']                              # (N, H*F)
        hh = h.reshape(n, heads, hidden)
        e_dst = jnp.einsum('nhf,hf->nh', hh, params[f'adst{l}'])
        e_src = jnp.einsum('nhf,hf->nh', hh, params[f'asrc{l}'])
        outs = []
        for hd in range(heads):
            z = e_dst[:, hd][:, None] + e_src[:, hd][None, :]
            z = jnp.maximum(z, 0.2 * z)
            z = jnp.where(adjf > 0, z, -MASK_SCALE)
            alpha = jax.nn.softmax(z, axis=-1)
            outs.append(alpha @ hh[:, hd, :])
        act = jax.nn.relu(jnp.concatenate(outs, axis=-1) + params[f'b{l}'])
    pooled = jnp.mean(act, axis=0, keepdims=True)
    h1 = jax.nn.relu(pooled @ params['w_lin1'] + params['b_lin1'])
    return h1 @ params['w_lin2'] + params['b_lin2']


def init_params(key, in_channels, hidden, out_channels, heads):
    ks = jax.random.split(key, 20)

    def glorot(k, shape):
        s = jnp.sqrt(2.0 / (shape[0] + shape[-1]))
        return jax.random.normal(k, shape, jnp.float32) * s

    hf = hidden * heads
    p = {}
    dims_in = [in_channels, hf, hf]
    for l in range(3):
        p[f'w{l}'] = glorot(ks[4 * l + 0], (dims_in[l], hf))
        p[f'asrc{l}'] = glorot(ks[4 * l + 1], (heads, hidden))
        p[f'adst{l}'] = glorot(ks[4 * l + 2], (heads, hidden))
        p[f'b{l}'] = 0.01 * jax.random.normal(ks[4 * l + 3], (1, hf), jnp.float32)
    p['w_lin1'] = glorot(ks[12], (hf, 5 * out_channels))
    p['b_lin1'] = 0.01 * jax.random.normal(ks[13], (1, 5 * out_channels), jnp.float32)
    p['w_lin2'] = glorot(ks[14], (5 * out_channels, out_channels))
    p['b_lin2'] = 0.01 * jax.random.normal(ks[15], (1, out_channels), jnp.float32)
    return p


def build_adjacency(edge_index, n):
    # edge_index[0] = source node j, edge_index[1] = target node i (PyG convention).
    src, dst = edge_index
    adj = jnp.zeros((n, n), jnp.int8)
    adj = adj.at[dst, src].set(1)
    adj = adj.at[jnp.arange(n), jnp.arange(n)].set(1)   # add_self_loops=True
    return adj


if __name__ == "__main__":
    N = 16            # number of graph nodes (single graph -> batch = zeros)
    IN_CH = 8
    HIDDEN = 8
    HEADS = 4
    OUT_CH = 4

    key = jax.random.PRNGKey(0)
    k_x, k_p = jax.random.split(key)

    x = jax.random.normal(k_x, (N, IN_CH), jnp.float32)

    # Bidirectional ring graph as edge_index (2, 2N).
    fwd_src = jnp.arange(N)
    fwd_dst = (jnp.arange(N) + 1) % N
    edge_index = jnp.stack([
        jnp.concatenate([fwd_src, fwd_dst]),
        jnp.concatenate([fwd_dst, fwd_src]),
    ])
    adj = build_adjacency(edge_index, N)

    params = init_params(k_p, IN_CH, HIDDEN, OUT_CH, HEADS)

    out = simple_gat_forward(params, x, adj, heads=HEADS, hidden=HIDDEN)
    out = jax.block_until_ready(out)

    assert out.shape == (1, OUT_CH), out.shape
    assert jnp.all(jnp.isfinite(out))

    ref = simple_gat_reference(params, x, adj, heads=HEADS, hidden=HIDDEN)
    ref = jax.block_until_ready(ref)
    err = float(jnp.max(jnp.abs(out - ref)))
    tol = 0.05 + 0.05 * float(jnp.max(jnp.abs(ref)))   # bf16 MXU feeds + approx recip
    assert err <= tol, (err, tol)

    print("KERNEL_OK")
</pallas_src>

<mosaic_0001>
module attributes {stable_mosaic.version = 11 : i64} {
  func.func @_simple_gat_kernel(%arg0: memref<16x8xf32, #tpu.memory_space<vmem>>, %arg1: memref<16x16xi8, #tpu.memory_space<vmem>>, %arg2: memref<8x32xbf16, #tpu.memory_space<vmem>>, %arg3: memref<32x8xbf16, #tpu.memory_space<vmem>>, %arg4: memref<1x32xf32, #tpu.memory_space<vmem>>, %arg5: memref<32x32xbf16, #tpu.memory_space<vmem>>, %arg6: memref<32x8xbf16, #tpu.memory_space<vmem>>, %arg7: memref<1x32xf32, #tpu.memory_space<vmem>>, %arg8: memref<32x32xbf16, #tpu.memory_space<vmem>>, %arg9: memref<32x8xbf16, #tpu.memory_space<vmem>>, %arg10: memref<1x32xf32, #tpu.memory_space<vmem>>, %arg11: memref<32x20xf32, #tpu.memory_space<vmem>>, %arg12: memref<1x20xf32, #tpu.memory_space<vmem>>, %arg13: memref<20x4xf32, #tpu.memory_space<vmem>>, %arg14: memref<1x4xf32, #tpu.memory_space<vmem>>, %arg15: memref<1x4xf32, #tpu.memory_space<vmem>>) attributes {dimension_semantics = [], scalar_prefetch = 0 : i64, scratch_operands = 0 : i64, tpu.core_type = #tpu.core_type<tc>} {
    %c0 = arith.constant 0 : index
    %c0_0 = arith.constant 0 : index
    %0 = vector.load %arg1[%c0, %c0_0] : memref<16x16xi8, #tpu.memory_space<vmem>>, vector<16x16xi8>
    %1 = arith.sitofp %0 : vector<16x16xi8> to vector<16x16xf32>
    %cst = arith.constant 0.000000e+00 : f32
    %2 = vector.broadcast %cst : f32 to vector<16x16xf32>
    %3 = arith.cmpf ogt, %1, %2 : vector<16x16xf32>
    %c0_1 = arith.constant 0 : index
    %c0_2 = arith.constant 0 : index
    %4 = vector.load %arg0[%c0_1, %c0_2] : memref<16x8xf32, #tpu.memory_space<vmem>>, vector<16x8xf32>
    %c0_3 = arith.constant 0 : index
    %c0_4 = arith.constant 0 : index
    %5 = vector.load %arg2[%c0_3, %c0_4] : memref<8x32xbf16, #tpu.memory_space<vmem>>, vector<8x32xbf16>
    %6 = arith.truncf %4 : vector<16x8xf32> to vector<16x8xbf16>
    %cst_5 = arith.constant dense<0.000000e+00> : vector<16x32xf32>
    %7 = tpu.matmul %6, %5, %cst_5 {dimension_numbers = #tpu.dot_dimension_numbers<[1], [0], [0], [1], [0, 0, 1, 1], [], []>} : vector<16x8xbf16>, vector<8x32xbf16>, vector<16x32xf32> -> vector<16x32xf32>
    %8 = arith.truncf %7 : vector<16x32xf32> to vector<16x32xbf16>
    %c0_6 = arith.constant 0 : index
    %c0_7 = arith.constant 0 : index
    %9 = vector.load %arg3[%c0_6, %c0_7] : memref<32x8xbf16, #tpu.memory_space<vmem>>, vector<32x8xbf16>
    %cst_8 = arith.constant dense<0.000000e+00> : vector<16x8xf32>
    %10 = tpu.matmul %8, %9, %cst_8 {dimension_numbers = #tpu.dot_dimension_numbers<[1], [0], [0], [1], [0, 0, 1, 1], [], []>} : vector<16x32xbf16>, vector<32x8xbf16>, vector<16x8xf32> -> vector<16x8xf32>
    %11 = vector.extract_strided_slice %10 {offsets = [0, 0], sizes = [16, 4], strides = [1, 1]} : vector<16x8xf32> to vector<16x4xf32>
    %12 = vector.extract_strided_slice %10 {offsets = [0, 4], sizes = [16, 4], strides = [1, 1]} : vector<16x8xf32> to vector<16x4xf32>
    %13 = tpu.transpose %12, [1, 0] : vector<16x4xf32> -> vector<4x16xf32>
    %14 = vector.extract_strided_slice %11 {offsets = [0, 0], sizes = [16, 1], strides = [1, 1]} : vector<16x4xf32> to vector<16x1xf32>
    %15 = vector.extract_strided_slice %13 {offsets = [0, 0], sizes = [1, 16], strides = [1, 1]} : vector<4x16xf32> to vector<1x16xf32>
    %16 = vector.broadcast %14 : vector<16x1xf32> to vector<16x16xf32>
    %17 = vector.broadcast %15 : vector<1x16xf32> to vector<16x16xf32>
    %18 = arith.addf %16, %17 : vector<16x16xf32>
    %cst_9 = arith.constant 2.000000e-01 : f32
    %19 = vector.broadcast %cst_9 : f32 to vector<16x16xf32>
    %20 = arith.mulf %19, %18 : vector<16x16xf32>
    %21 = arith.maximumf %18, %20 : vector<16x16xf32>
    %cst_10 = arith.constant -1.000000e+30 : f32
    %22 = vector.broadcast %cst_10 : f32 to vector<16x16xf32>
    %23 = arith.select %3, %21, %22 : vector<16x16xi1>, vector<16x16xf32>
    %cst_11 = arith.constant dense<0xFF800000> : vector<16xf32>
    %24 = vector.multi_reduction <maximumf>, %23, %cst_11 [1] : vector<16x16xf32> to vector<16xf32>
    %25 = vector.shape_cast %24 : vector<16xf32> to vector<16x1xf32>
    %26 = vector.broadcast %25 : vector<16x1xf32> to vector<16x16xf32>
    %27 = arith.subf %23, %26 : vector<16x16xf32>
    %28 = math.exp %27 : vector<16x16xf32>
    %cst_12 = arith.constant dense<0.000000e+00> : vector<16xf32>
    %29 = vector.multi_reduction <add>, %28, %cst_12 [1] : vector<16x16xf32> to vector<16xf32>
    %30 = vector.shape_cast %29 : vector<16xf32> to vector<16x1xf32>
    %31 = tpu.reciprocal %30 {approx = true} : vector<16x1xf32> -> vector<16x1xf32>
    %32 = vector.broadcast %31 : vector<16x1xf32> to vector<16x16xf32>
    %33 = arith.mulf %28, %32 : vector<16x16xf32>
    %34 = vector.extract_strided_slice %8 {offsets = [0, 0], sizes = [16, 8], strides = [1, 1]} : vector<16x32xbf16> to vector<16x8xbf16>
    %35 = arith.truncf %33 : vector<16x16xf32> to vector<16x16xbf16>
    %cst_13 = arith.constant dense<0.000000e+00> : vector<16x8xf32>
    %36 = tpu.matmul %35, %34, %cst_13 {dimension_numbers = #tpu.dot_dimension_numbers<[1], [0], [0], [1], [0, 0, 1, 1], [], []>} : vector<16x16xbf16>, vector<16x8xbf16>, vector<16x8xf32> -> vector<16x8xf32>
    %37 = vector.extract_strided_slice %11 {offsets = [0, 1], sizes = [16, 1], strides = [1, 1]} : vector<16x4xf32> to vector<16x1xf32>
    %38 = vector.extract_strided_slice %13 {offsets = [1, 0], sizes = [1, 16], strides = [1, 1]} : vector<4x16xf32> to vector<1x16xf32>
    %39 = vector.broadcast %37 : vector<16x1xf32> to vector<16x16xf32>
    %40 = vector.broadcast %38 : vector<1x16xf32> to vector<16x16xf32>
    %41 = arith.addf %39, %40 : vector<16x16xf32>
    %cst_14 = arith.constant 2.000000e-01 : f32
    %42 = vector.broadcast %cst_14 : f32 to vector<16x16xf32>
    %43 = arith.mulf %42, %41 : vector<16x16xf32>
    %44 = arith.maximumf %41, %43 : vector<16x16xf32>
    %cst_15 = arith.constant -1.000000e+30 : f32
    %45 = vector.broadcast %cst_15 : f32 to vector<16x16xf32>
    %46 = arith.select %3, %44, %45 : vector<16x16xi1>, vector<16x16xf32>
    %cst_16 = arith.constant dense<0xFF800000> : vector<16xf32>
    %47 = vector.multi_reduction <maximumf>, %46, %cst_16 [1] : vector<16x16xf32> to vector<16xf32>
    %48 = vector.shape_cast %47 : vector<16xf32> to vector<16x1xf32>
    %49 = vector.broadcast %48 : vector<16x1xf32> to vector<16x16xf32>
    %50 = arith.subf %46, %49 : vector<16x16xf32>
    %51 = math.exp %50 : vector<16x16xf32>
    %cst_17 = arith.constant dense<0.000000e+00> : vector<16xf32>
    %52 = vector.multi_reduction <add>, %51, %cst_17 [1] : vector<16x16xf32> to vector<16xf32>
    %53 = vector.shape_cast %52 : vector<16xf32> to vector<16x1xf32>
    %54 = tpu.reciprocal %53 {approx = true} : vector<16x1xf32> -> vector<16x1xf32>
    %55 = vector.broadcast %54 : vector<16x1xf32> to vector<16x16xf32>
    %56 = arith.mulf %51, %55 : vector<16x16xf32>
    %57 = vector.extract_strided_slice %8 {offsets = [0, 8], sizes = [16, 8], strides = [1, 1]} : vector<16x32xbf16> to vector<16x8xbf16>
    %58 = arith.truncf %56 : vector<16x16xf32> to vector<16x16xbf16>
    %cst_18 = arith.constant dense<0.000000e+00> : vector<16x8xf32>
    %59 = tpu.matmul %58, %57, %cst_18 {dimension_numbers = #tpu.dot_dimension_numbers<[1], [0], [0], [1], [0, 0, 1, 1], [], []>} : vector<16x16xbf16>, vector<16x8xbf16>, vector<16x8xf32> -> vector<16x8xf32>
    %60 = vector.extract_strided_slice %11 {offsets = [0, 2], sizes = [16, 1], strides = [1, 1]} : vector<16x4xf32> to vector<16x1xf32>
    %61 = vector.extract_strided_slice %13 {offsets = [2, 0], sizes = [1, 16], strides = [1, 1]} : vector<4x16xf32> to vector<1x16xf32>
    %62 = vector.broadcast %60 : vector<16x1xf32> to vector<16x16xf32>
    %63 = vector.broadcast %61 : vector<1x16xf32> to vector<16x16xf32>
    %64 = arith.addf %62, %63 : vector<16x16xf32>
    %cst_19 = arith.constant 2.000000e-01 : f32
    %65 = vector.broadcast %cst_19 : f32 to vector<16x16xf32>
    %66 = arith.mulf %65, %64 : vector<16x16xf32>
    %67 = arith.maximumf %64, %66 : vector<16x16xf32>
    %cst_20 = arith.constant -1.000000e+30 : f32
    %68 = vector.broadcast %cst_20 : f32 to vector<16x16xf32>
    %69 = arith.select %3, %67, %68 : vector<16x16xi1>, vector<16x16xf32>
    %cst_21 = arith.constant dense<0xFF800000> : vector<16xf32>
    %70 = vector.multi_reduction <maximumf>, %69, %cst_21 [1] : vector<16x16xf32> to vector<16xf32>
    %71 = vector.shape_cast %70 : vector<16xf32> to vector<16x1xf32>
    %72 = vector.broadcast %71 : vector<16x1xf32> to vector<16x16xf32>
    %73 = arith.subf %69, %72 : vector<16x16xf32>
    %74 = math.exp %73 : vector<16x16xf32>
    %cst_22 = arith.constant dense<0.000000e+00> : vector<16xf32>
    %75 = vector.multi_reduction <add>, %74, %cst_22 [1] : vector<16x16xf32> to vector<16xf32>
    %76 = vector.shape_cast %75 : vector<16xf32> to vector<16x1xf32>
    %77 = tpu.reciprocal %76 {approx = true} : vector<16x1xf32> -> vector<16x1xf32>
    %78 = vector.broadcast %77 : vector<16x1xf32> to vector<16x16xf32>
    %79 = arith.mulf %74, %78 : vector<16x16xf32>
    %80 = vector.extract_strided_slice %8 {offsets = [0, 16], sizes = [16, 8], strides = [1, 1]} : vector<16x32xbf16> to vector<16x8xbf16>
    %81 = arith.truncf %79 : vector<16x16xf32> to vector<16x16xbf16>
    %cst_23 = arith.constant dense<0.000000e+00> : vector<16x8xf32>
    %82 = tpu.matmul %81, %80, %cst_23 {dimension_numbers = #tpu.dot_dimension_numbers<[1], [0], [0], [1], [0, 0, 1, 1], [], []>} : vector<16x16xbf16>, vector<16x8xbf16>, vector<16x8xf32> -> vector<16x8xf32>
    %83 = vector.extract_strided_slice %11 {offsets = [0, 3], sizes = [16, 1], strides = [1, 1]} : vector<16x4xf32> to vector<16x1xf32>
    %84 = vector.extract_strided_slice %13 {offsets = [3, 0], sizes = [1, 16], strides = [1, 1]} : vector<4x16xf32> to vector<1x16xf32>
    %85 = vector.broadcast %83 : vector<16x1xf32> to vector<16x16xf32>
    %86 = vector.broadcast %84 : vector<1x16xf32> to vector<16x16xf32>
    %87 = arith.addf %85, %86 : vector<16x16xf32>
    %cst_24 = arith.constant 2.000000e-01 : f32
    %88 = vector.broadcast %cst_24 : f32 to vector<16x16xf32>
    %89 = arith.mulf %88, %87 : vector<16x16xf32>
    %90 = arith.maximumf %87, %89 : vector<16x16xf32>
    %cst_25 = arith.constant -1.000000e+30 : f32
    %91 = vector.broadcast %cst_25 : f32 to vector<16x16xf32>
    %92 = arith.select %3, %90, %91 : vector<16x16xi1>, vector<16x16xf32>
    %cst_26 = arith.constant dense<0xFF800000> : vector<16xf32>
    %93 = vector.multi_reduction <maximumf>, %92, %cst_26 [1] : vector<16x16xf32> to vector<16xf32>
    %94 = vector.shape_cast %93 : vector<16xf32> to vector<16x1xf32>
    %95 = vector.broadcast %94 : vector<16x1xf32> to vector<16x16xf32>
    %96 = arith.subf %92, %95 : vector<16x16xf32>
    %97 = math.exp %96 : vector<16x16xf32>
    %cst_27 = arith.constant dense<0.000000e+00> : vector<16xf32>
    %98 = vector.multi_reduction <add>, %97, %cst_27 [1] : vector<16x16xf32> to vector<16xf32>
    %99 = vector.shape_cast %98 : vector<16xf32> to vector<16x1xf32>
    %100 = tpu.reciprocal %99 {approx = true} : vector<16x1xf32> -> vector<16x1xf32>
    %101 = vector.broadcast %100 : vector<16x1xf32> to vector<16x16xf32>
    %102 = arith.mulf %97, %101 : vector<16x16xf32>
    %103 = vector.extract_strided_slice %8 {offsets = [0, 24], sizes = [16, 8], strides = [1, 1]} : vector<16x32xbf16> to vector<16x8xbf16>
    %104 = arith.truncf %102 : vector<16x16xf32> to vector<16x16xbf16>
    %cst_28 = arith.constant dense<0.000000e+00> : vector<16x8xf32>
    %105 = tpu.matmul %104, %103, %cst_28 {dimension_numbers = #tpu.dot_dimension_numbers<[1], [0], [0], [1], [0, 0, 1, 1], [], []>} : vector<16x16xbf16>, vector<16x8xbf16>, vector<16x8xf32> -> vector<16x8xf32>
    %106 = tpu.concatenate %36, %59, %82, %105 in 1 : vector<16x8xf32>, vector<16x8xf32>, vector<16x8xf32>, vector<16x8xf32> -> vector<16x32xf32>
    %c0_29 = arith.constant 0 : index
    %c0_30 = arith.constant 0 : index
    %107 = vector.load %arg4[%c0_29, %c0_30] : memref<1x32xf32, #tpu.memory_space<vmem>>, vector<1x32xf32>
    %108 = vector.broadcast %107 : vector<1x32xf32> to vector<16x32xf32>
    %109 = arith.addf %106, %108 : vector<16x32xf32>
    %cst_31 = arith.constant 0.000000e+00 : f32
    %110 = vector.broadcast %cst_31 : f32 to vector<16x32xf32>
    %111 = arith.maximumf %109, %110 : vector<16x32xf32>
    %c0_32 = arith.constant 0 : index
    %c0_33 = arith.constant 0 : index
    %112 = vector.load %arg5[%c0_32, %c0_33] : memref<32x32xbf16, #tpu.memory_space<vmem>>, vector<32x32xbf16>
    %113 = arith.truncf %111 : vector<16x32xf32> to vector<16x32xbf16>
    %cst_34 = arith.constant dense<0.000000e+00> : vector<16x32xf32>
    %114 = tpu.matmul %113, %112, %cst_34 {dimension_numbers = #tpu.dot_dimension_numbers<[1], [0], [0], [1], [0, 0, 1, 1], [], []>} : vector<16x32xbf16>, vector<32x32xbf16>, vector<16x32xf32> -> vector<16x32xf32>
    %115 = arith.truncf %114 : vector<16x32xf32> to vector<16x32xbf16>
    %c0_35 = arith.constant 0 : index
    %c0_36 = arith.constant 0 : index
    %116 = vector.load %arg6[%c0_35, %c0_36] : memref<32x8xbf16, #tpu.memory_space<vmem>>, vector<32x8xbf16>
    %cst_37 = arith.constant dense<0.000000e+00> : vector<16x8xf32>
    %117 = tpu.matmul %115, %116, %cst_37 {dimension_numbers = #tpu.dot_dimension_numbers<[1], [0], [0], [1], [0, 0, 1, 1], [], []>} : vector<16x32xbf16>, vector<32x8xbf16>, vector<16x8xf32> -> vector<16x8xf32>
    %118 = vector.extract_strided_slice %117 {offsets = [0, 0], sizes = [16, 4], strides = [1, 1]} : vector<16x8xf32> to vector<16x4xf32>
    %119 = vector.extract_strided_slice %117 {offsets = [0, 4], sizes = [16, 4], strides = [1, 1]} : vector<16x8xf32> to vector<16x4xf32>
    %120 = tpu.transpose %119, [1, 0] : vector<16x4xf32> -> vector<4x16xf32>
    %121 = vector.extract_strided_slice %118 {offsets = [0, 0], sizes = [16, 1], strides = [1, 1]} : vector<16x4xf32> to vector<16x1xf32>
    %122 = vector.extract_strided_slice %120 {offsets = [0, 0], sizes = [1, 16], strides = [1, 1]} : vector<4x16xf32> to vector<1x16xf32>
    %123 = vector.broadcast %121 : vector<16x1xf32> to vector<16x16xf32>
    %124 = vector.broadcast %122 : vector<1x16xf32> to vector<16x16xf32>
    %125 = arith.addf %123, %124 : vector<16x16xf32>
    %cst_38 = arith.constant 2.000000e-01 : f32
    %126 = vector.broadcast %cst_38 : f32 to vector<16x16xf32>
    %127 = arith.mulf %126, %125 : vector<16x16xf32>
    %128 = arith.maximumf %125, %127 : vector<16x16xf32>
    %cst_39 = arith.constant -1.000000e+30 : f32
    %129 = vector.broadcast %cst_39 : f32 to vector<16x16xf32>
    %130 = arith.select %3, %128, %129 : vector<16x16xi1>, vector<16x16xf32>
    %cst_40 = arith.constant dense<0xFF800000> : vector<16xf32>
    %131 = vector.multi_reduction <maximumf>, %130, %cst_40 [1] : vector<16x16xf32> to vector<16xf32>
    %132 = vector.shape_cast %131 : vector<16xf32> to vector<16x1xf32>
    %133 = vector.broadcast %132 : vector<16x1xf32> to vector<16x16xf32>
    %134 = arith.subf %130, %133 : vector<16x16xf32>
    %135 = math.exp %134 : vector<16x16xf32>
    %cst_41 = arith.constant dense<0.000000e+00> : vector<16xf32>
    %136 = vector.multi_reduction <add>, %135, %cst_41 [1] : vector<16x16xf32> to vector<16xf32>
    %137 = vector.shape_cast %136 : vector<16xf32> to vector<16x1xf32>
    %138 = tpu.reciprocal %137 {approx = true} : vector<16x1xf32> -> vector<16x1xf32>
    %139 = vector.broadcast %138 : vector<16x1xf32> to vector<16x16xf32>
    %140 = arith.mulf %135, %139 : vector<16x16xf32>
    %141 = vector.extract_strided_slice %115 {offsets = [0, 0], sizes = [16, 8], strides = [1, 1]} : vector<16x32xbf16> to vector<16x8xbf16>
    %142 = arith.truncf %140 : vector<16x16xf32> to vector<16x16xbf16>
    %cst_42 = arith.constant dense<0.000000e+00> : vector<16x8xf32>
    %143 = tpu.matmul %142, %141, %cst_42 {dimension_numbers = #tpu.dot_dimension_numbers<[1], [0], [0], [1], [0, 0, 1, 1], [], []>} : vector<16x16xbf16>, vector<16x8xbf16>, vector<16x8xf32> -> vector<16x8xf32>
    %144 = vector.extract_strided_slice %118 {offsets = [0, 1], sizes = [16, 1], strides = [1, 1]} : vector<16x4xf32> to vector<16x1xf32>
    %145 = vector.extract_strided_slice %120 {offsets = [1, 0], sizes = [1, 16], strides = [1, 1]} : vector<4x16xf32> to vector<1x16xf32>
    %146 = vector.broadcast %144 : vector<16x1xf32> to vector<16x16xf32>
    %147 = vector.broadcast %145 : vector<1x16xf32> to vector<16x16xf32>
    %148 = arith.addf %146, %147 : vector<16x16xf32>
    %cst_43 = arith.constant 2.000000e-01 : f32
    %149 = vector.broadcast %cst_43 : f32 to vector<16x16xf32>
    %150 = arith.mulf %149, %148 : vector<16x16xf32>
    %151 = arith.maximumf %148, %150 : vector<16x16xf32>
    %cst_44 = arith.constant -1.000000e+30 : f32
    %152 = vector.broadcast %cst_44 : f32 to vector<16x16xf32>
    %153 = arith.select %3, %151, %152 : vector<16x16xi1>, vector<16x16xf32>
    %cst_45 = arith.constant dense<0xFF800000> : vector<16xf32>
    %154 = vector.multi_reduction <maximumf>, %153, %cst_45 [1] : vector<16x16xf32> to vector<16xf32>
    %155 = vector.shape_cast %154 : vector<16xf32> to vector<16x1xf32>
    %156 = vector.broadcast %155 : vector<16x1xf32> to vector<16x16xf32>
    %157 = arith.subf %153, %156 : vector<16x16xf32>
    %158 = math.exp %157 : vector<16x16xf32>
    %cst_46 = arith.constant dense<0.000000e+00> : vector<16xf32>
    %159 = vector.multi_reduction <add>, %158, %cst_46 [1] : vector<16x16xf32> to vector<16xf32>
    %160 = vector.shape_cast %159 : vector<16xf32> to vector<16x1xf32>
    %161 = tpu.reciprocal %160 {approx = true} : vector<16x1xf32> -> vector<16x1xf32>
    %162 = vector.broadcast %161 : vector<16x1xf32> to vector<16x16xf32>
    %163 = arith.mulf %158, %162 : vector<16x16xf32>
    %164 = vector.extract_strided_slice %115 {offsets = [0, 8], sizes = [16, 8], strides = [1, 1]} : vector<16x32xbf16> to vector<16x8xbf16>
    %165 = arith.truncf %163 : vector<16x16xf32> to vector<16x16xbf16>
    %cst_47 = arith.constant dense<0.000000e+00> : vector<16x8xf32>
    %166 = tpu.matmul %165, %164, %cst_47 {dimension_numbers = #tpu.dot_dimension_numbers<[1], [0], [0], [1], [0, 0, 1, 1], [], []>} : vector<16x16xbf16>, vector<16x8xbf16>, vector<16x8xf32> -> vector<16x8xf32>
    %167 = vector.extract_strided_slice %118 {offsets = [0, 2], sizes = [16, 1], strides = [1, 1]} : vector<16x4xf32> to vector<16x1xf32>
    %168 = vector.extract_strided_slice %120 {offsets = [2, 0], sizes = [1, 16], strides = [1, 1]} : vector<4x16xf32> to vector<1x16xf32>
    %169 = vector.broadcast %167 : vector<16x1xf32> to vector<16x16xf32>
    %170 = vector.broadcast %168 : vector<1x16xf32> to vector<16x16xf32>
    %171 = arith.addf %169, %170 : vector<16x16xf32>
    %cst_48 = arith.constant 2.000000e-01 : f32
    %172 = vector.broadcast %cst_48 : f32 to vector<16x16xf32>
    %173 = arith.mulf %172, %171 : vector<16x16xf32>
    %174 = arith.maximumf %171, %173 : vector<16x16xf32>
    %cst_49 = arith.constant -1.000000e+30 : f32
    %175 = vector.broadcast %cst_49 : f32 to vector<16x16xf32>
    %176 = arith.select %3, %174, %175 : vector<16x16xi1>, vector<16x16xf32>
    %cst_50 = arith.constant dense<0xFF800000> : vector<16xf32>
    %177 = vector.multi_reduction <maximumf>, %176, %cst_50 [1] : vector<16x16xf32> to vector<16xf32>
    %178 = vector.shape_cast %177 : vector<16xf32> to vector<16x1xf32>
    %179 = vector.broadcast %178 : vector<16x1xf32> to vector<16x16xf32>
    %180 = arith.subf %176, %179 : vector<16x16xf32>
    %181 = math.exp %180 : vector<16x16xf32>
    %cst_51 = arith.constant dense<0.000000e+00> : vector<16xf32>
    %182 = vector.multi_reduction <add>, %181, %cst_51 [1] : vector<16x16xf32> to vector<16xf32>
    %183 = vector.shape_cast %182 : vector<16xf32> to vector<16x1xf32>
    %184 = tpu.reciprocal %183 {approx = true} : vector<16x1xf32> -> vector<16x1xf32>
    %185 = vector.broadcast %184 : vector<16x1xf32> to vector<16x16xf32>
    %186 = arith.mulf %181, %185 : vector<16x16xf32>
    %187 = vector.extract_strided_slice %115 {offsets = [0, 16], sizes = [16, 8], strides = [1, 1]} : vector<16x32xbf16> to vector<16x8xbf16>
    %188 = arith.truncf %186 : vector<16x16xf32> to vector<16x16xbf16>
    %cst_52 = arith.constant dense<0.000000e+00> : vector<16x8xf32>
    %189 = tpu.matmul %188, %187, %cst_52 {dimension_numbers = #tpu.dot_dimension_numbers<[1], [0], [0], [1], [0, 0, 1, 1], [], []>} : vector<16x16xbf16>, vector<16x8xbf16>, vector<16x8xf32> -> vector<16x8xf32>
    %190 = vector.extract_strided_slice %118 {offsets = [0, 3], sizes = [16, 1], strides = [1, 1]} : vector<16x4xf32> to vector<16x1xf32>
    %191 = vector.extract_strided_slice %120 {offsets = [3, 0], sizes = [1, 16], strides = [1, 1]} : vector<4x16xf32> to vector<1x16xf32>
    %192 = vector.broadcast %190 : vector<16x1xf32> to vector<16x16xf32>
    %193 = vector.broadcast %191 : vector<1x16xf32> to vector<16x16xf32>
    %194 = arith.addf %192, %193 : vector<16x16xf32>
    %cst_53 = arith.constant 2.000000e-01 : f32
    %195 = vector.broadcast %cst_53 : f32 to vector<16x16xf32>
    %196 = arith.mulf %195, %194 : vector<16x16xf32>
    %197 = arith.maximumf %194, %196 : vector<16x16xf32>
    %cst_54 = arith.constant -1.000000e+30 : f32
    %198 = vector.broadcast %cst_54 : f32 to vector<16x16xf32>
    %199 = arith.select %3, %197, %198 : vector<16x16xi1>, vector<16x16xf32>
    %cst_55 = arith.constant dense<0xFF800000> : vector<16xf32>
    %200 = vector.multi_reduction <maximumf>, %199, %cst_55 [1] : vector<16x16xf32> to vector<16xf32>
    %201 = vector.shape_cast %200 : vector<16xf32> to vector<16x1xf32>
    %202 = vector.broadcast %201 : vector<16x1xf32> to vector<16x16xf32>
    %203 = arith.subf %199, %202 : vector<16x16xf32>
    %204 = math.exp %203 : vector<16x16xf32>
    %cst_56 = arith.constant dense<0.000000e+00> : vector<16xf32>
    %205 = vector.multi_reduction <add>, %204, %cst_56 [1] : vector<16x16xf32> to vector<16xf32>
    %206 = vector.shape_cast %205 : vector<16xf32> to vector<16x1xf32>
    %207 = tpu.reciprocal %206 {approx = true} : vector<16x1xf32> -> vector<16x1xf32>
    %208 = vector.broadcast %207 : vector<16x1xf32> to vector<16x16xf32>
    %209 = arith.mulf %204, %208 : vector<16x16xf32>
    %210 = vector.extract_strided_slice %115 {offsets = [0, 24], sizes = [16, 8], strides = [1, 1]} : vector<16x32xbf16> to vector<16x8xbf16>
    %211 = arith.truncf %209 : vector<16x16xf32> to vector<16x16xbf16>
    %cst_57 = arith.constant dense<0.000000e+00> : vector<16x8xf32>
    %212 = tpu.matmul %211, %210, %cst_57 {dimension_numbers = #tpu.dot_dimension_numbers<[1], [0], [0], [1], [0, 0, 1, 1], [], []>} : vector<16x16xbf16>, vector<16x8xbf16>, vector<16x8xf32> -> vector<16x8xf32>
    %213 = tpu.concatenate %143, %166, %189, %212 in 1 : vector<16x8xf32>, vector<16x8xf32>, vector<16x8xf32>, vector<16x8xf32> -> vector<16x32xf32>
    %c0_58 = arith.constant 0 : index
    %c0_59 = arith.constant 0 : index
    %214 = vector.load %arg7[%c0_58, %c0_59] : memref<1x32xf32, #tpu.memory_space<vmem>>, vector<1x32xf32>
    %215 = vector.broadcast %214 : vector<1x32xf32> to vector<16x32xf32>
    %216 = arith.addf %213, %215 : vector<16x32xf32>
    %cst_60 = arith.constant 0.000000e+00 : f32
    %217 = vector.broadcast %cst_60 : f32 to vector<16x32xf32>
    %218 = arith.maximumf %216, %217 : vector<16x32xf32>
    %c0_61 = arith.constant 0 : index
    %c0_62 = arith.constant 0 : index
    %219 = vector.load %arg8[%c0_61, %c0_62] : memref<32x32xbf16, #tpu.memory_space<vmem>>, vector<32x32xbf16>
    %220 = arith.truncf %218 : vector<16x32xf32> to vector<16x32xbf16>
    %cst_63 = arith.constant dense<0.000000e+00> : vector<16x32xf32>
    %221 = tpu.matmul %220, %219, %cst_63 {dimension_numbers = #tpu.dot_dimension_numbers<[1], [0], [0], [1], [0, 0, 1, 1], [], []>} : vector<16x32xbf16>, vector<32x32xbf16>, vector<16x32xf32> -> vector<16x32xf32>
    %222 = arith.truncf %221 : vector<16x32xf32> to vector<16x32xbf16>
    %c0_64 = arith.constant 0 : index
    %c0_65 = arith.constant 0 : index
    %223 = vector.load %arg9[%c0_64, %c0_65] : memref<32x8xbf16, #tpu.memory_space<vmem>>, vector<32x8xbf16>
    %cst_66 = arith.constant dense<0.000000e+00> : vector<16x8xf32>
    %224 = tpu.matmul %222, %223, %cst_66 {dimension_numbers = #tpu.dot_dimension_numbers<[1], [0], [0], [1], [0, 0, 1, 1], [], []>} : vector<16x32xbf16>, vector<32x8xbf16>, vector<16x8xf32> -> vector<16x8xf32>
    %225 = vector.extract_strided_slice %224 {offsets = [0, 0], sizes = [16, 4], strides = [1, 1]} : vector<16x8xf32> to vector<16x4xf32>
    %226 = vector.extract_strided_slice %224 {offsets = [0, 4], sizes = [16, 4], strides = [1, 1]} : vector<16x8xf32> to vector<16x4xf32>
    %227 = tpu.transpose %226, [1, 0] : vector<16x4xf32> -> vector<4x16xf32>
    %228 = vector.extract_strided_slice %225 {offsets = [0, 0], sizes = [16, 1], strides = [1, 1]} : vector<16x4xf32> to vector<16x1xf32>
    %229 = vector.extract_strided_slice %227 {offsets = [0, 0], sizes = [1, 16], strides = [1, 1]} : vector<4x16xf32> to vector<1x16xf32>
    %230 = vector.broadcast %228 : vector<16x1xf32> to vector<16x16xf32>
    %231 = vector.broadcast %229 : vector<1x16xf32> to vector<16x16xf32>
    %232 = arith.addf %230, %231 : vector<16x16xf32>
    %cst_67 = arith.constant 2.000000e-01 : f32
    %233 = vector.broadcast %cst_67 : f32 to vector<16x16xf32>
    %234 = arith.mulf %233, %232 : vector<16x16xf32>
    %235 = arith.maximumf %232, %234 : vector<16x16xf32>
    %cst_68 = arith.constant -1.000000e+30 : f32
    %236 = vector.broadcast %cst_68 : f32 to vector<16x16xf32>
    %237 = arith.select %3, %235, %236 : vector<16x16xi1>, vector<16x16xf32>
    %cst_69 = arith.constant dense<0xFF800000> : vector<16xf32>
    %238 = vector.multi_reduction <maximumf>, %237, %cst_69 [1] : vector<16x16xf32> to vector<16xf32>
    %239 = vector.shape_cast %238 : vector<16xf32> to vector<16x1xf32>
    %240 = vector.broadcast %239 : vector<16x1xf32> to vector<16x16xf32>
    %241 = arith.subf %237, %240 : vector<16x16xf32>
    %242 = math.exp %241 : vector<16x16xf32>
    %cst_70 = arith.constant dense<0.000000e+00> : vector<16xf32>
    %243 = vector.multi_reduction <add>, %242, %cst_70 [1] : vector<16x16xf32> to vector<16xf32>
    %244 = vector.shape_cast %243 : vector<16xf32> to vector<16x1xf32>
    %245 = tpu.reciprocal %244 {approx = true} : vector<16x1xf32> -> vector<16x1xf32>
    %246 = vector.broadcast %245 : vector<16x1xf32> to vector<16x16xf32>
    %247 = arith.mulf %242, %246 : vector<16x16xf32>
    %248 = vector.extract_strided_slice %222 {offsets = [0, 0], sizes = [16, 8], strides = [1, 1]} : vector<16x32xbf16> to vector<16x8xbf16>
    %249 = arith.truncf %247 : vector<16x16xf32> to vector<16x16xbf16>
    %cst_71 = arith.constant dense<0.000000e+00> : vector<16x8xf32>
    %250 = tpu.matmul %249, %248, %cst_71 {dimension_numbers = #tpu.dot_dimension_numbers<[1], [0], [0], [1], [0, 0, 1, 1], [], []>} : vector<16x16xbf16>, vector<16x8xbf16>, vector<16x8xf32> -> vector<16x8xf32>
    %251 = vector.extract_strided_slice %225 {offsets = [0, 1], sizes = [16, 1], strides = [1, 1]} : vector<16x4xf32> to vector<16x1xf32>
    %252 = vector.extract_strided_slice %227 {offsets = [1, 0], sizes = [1, 16], strides = [1, 1]} : vector<4x16xf32> to vector<1x16xf32>
    %253 = vector.broadcast %251 : vector<16x1xf32> to vector<16x16xf32>
    %254 = vector.broadcast %252 : vector<1x16xf32> to vector<16x16xf32>
    %255 = arith.addf %253, %254 : vector<16x16xf32>
    %cst_72 = arith.constant 2.000000e-01 : f32
    %256 = vector.broadcast %cst_72 : f32 to vector<16x16xf32>
    %257 = arith.mulf %256, %255 : vector<16x16xf32>
    %258 = arith.maximumf %255, %257 : vector<16x16xf32>
    %cst_73 = arith.constant -1.000000e+30 : f32
    %259 = vector.broadcast %cst_73 : f32 to vector<16x16xf32>
    %260 = arith.select %3, %258, %259 : vector<16x16xi1>, vector<16x16xf32>
    %cst_74 = arith.constant dense<0xFF800000> : vector<16xf32>
    %261 = vector.multi_reduction <maximumf>, %260, %cst_74 [1] : vector<16x16xf32> to vector<16xf32>
    %262 = vector.shape_cast %261 : vector<16xf32> to vector<16x1xf32>
    %263 = vector.broadcast %262 : vector<16x1xf32> to vector<16x16xf32>
    %264 = arith.subf %260, %263 : vector<16x16xf32>
    %265 = math.exp %264 : vector<16x16xf32>
    %cst_75 = arith.constant dense<0.000000e+00> : vector<16xf32>
    %266 = vector.multi_reduction <add>, %265, %cst_75 [1] : vector<16x16xf32> to vector<16xf32>
    %267 = vector.shape_cast %266 : vector<16xf32> to vector<16x1xf32>
    %268 = tpu.reciprocal %267 {approx = true} : vector<16x1xf32> -> vector<16x1xf32>
    %269 = vector.broadcast %268 : vector<16x1xf32> to vector<16x16xf32>
    %270 = arith.mulf %265, %269 : vector<16x16xf32>
    %271 = vector.extract_strided_slice %222 {offsets = [0, 8], sizes = [16, 8], strides = [1, 1]} : vector<16x32xbf16> to vector<16x8xbf16>
    %272 = arith.truncf %270 : vector<16x16xf32> to vector<16x16xbf16>
    %cst_76 = arith.constant dense<0.000000e+00> : vector<16x8xf32>
    %273 = tpu.matmul %272, %271, %cst_76 {dimension_numbers = #tpu.dot_dimension_numbers<[1], [0], [0], [1], [0, 0, 1, 1], [], []>} : vector<16x16xbf16>, vector<16x8xbf16>, vector<16x8xf32> -> vector<16x8xf32>
    %274 = vector.extract_strided_slice %225 {offsets = [0, 2], sizes = [16, 1], strides = [1, 1]} : vector<16x4xf32> to vector<16x1xf32>
    %275 = vector.extract_strided_slice %227 {offsets = [2, 0], sizes = [1, 16], strides = [1, 1]} : vector<4x16xf32> to vector<1x16xf32>
    %276 = vector.broadcast %274 : vector<16x1xf32> to vector<16x16xf32>
    %277 = vector.broadcast %275 : vector<1x16xf32> to vector<16x16xf32>
    %278 = arith.addf %276, %277 : vector<16x16xf32>
    %cst_77 = arith.constant 2.000000e-01 : f32
    %279 = vector.broadcast %cst_77 : f32 to vector<16x16xf32>
    %280 = arith.mulf %279, %278 : vector<16x16xf32>
    %281 = arith.maximumf %278, %280 : vector<16x16xf32>
    %cst_78 = arith.constant -1.000000e+30 : f32
    %282 = vector.broadcast %cst_78 : f32 to vector<16x16xf32>
    %283 = arith.select %3, %281, %282 : vector<16x16xi1>, vector<16x16xf32>
    %cst_79 = arith.constant dense<0xFF800000> : vector<16xf32>
    %284 = vector.multi_reduction <maximumf>, %283, %cst_79 [1] : vector<16x16xf32> to vector<16xf32>
    %285 = vector.shape_cast %284 : vector<16xf32> to vector<16x1xf32>
    %286 = vector.broadcast %285 : vector<16x1xf32> to vector<16x16xf32>
    %287 = arith.subf %283, %286 : vector<16x16xf32>
    %288 = math.exp %287 : vector<16x16xf32>
    %cst_80 = arith.constant dense<0.000000e+00> : vector<16xf32>
    %289 = vector.multi_reduction <add>, %288, %cst_80 [1] : vector<16x16xf32> to vector<16xf32>
    %290 = vector.shape_cast %289 : vector<16xf32> to vector<16x1xf32>
    %291 = tpu.reciprocal %290 {approx = true} : vector<16x1xf32> -> vector<16x1xf32>
    %292 = vector.broadcast %291 : vector<16x1xf32> to vector<16x16xf32>
    %293 = arith.mulf %288, %292 : vector<16x16xf32>
    %294 = vector.extract_strided_slice %222 {offsets = [0, 16], sizes = [16, 8], strides = [1, 1]} : vector<16x32xbf16> to vector<16x8xbf16>
    %295 = arith.truncf %293 : vector<16x16xf32> to vector<16x16xbf16>
    %cst_81 = arith.constant dense<0.000000e+00> : vector<16x8xf32>
    %296 = tpu.matmul %295, %294, %cst_81 {dimension_numbers = #tpu.dot_dimension_numbers<[1], [0], [0], [1], [0, 0, 1, 1], [], []>} : vector<16x16xbf16>, vector<16x8xbf16>, vector<16x8xf32> -> vector<16x8xf32>
    %297 = vector.extract_strided_slice %225 {offsets = [0, 3], sizes = [16, 1], strides = [1, 1]} : vector<16x4xf32> to vector<16x1xf32>
    %298 = vector.extract_strided_slice %227 {offsets = [3, 0], sizes = [1, 16], strides = [1, 1]} : vector<4x16xf32> to vector<1x16xf32>
    %299 = vector.broadcast %297 : vector<16x1xf32> to vector<16x16xf32>
    %300 = vector.broadcast %298 : vector<1x16xf32> to vector<16x16xf32>
    %301 = arith.addf %299, %300 : vector<16x16xf32>
    %cst_82 = arith.constant 2.000000e-01 : f32
    %302 = vector.broadcast %cst_82 : f32 to vector<16x16xf32>
    %303 = arith.mulf %302, %301 : vector<16x16xf32>
    %304 = arith.maximumf %301, %303 : vector<16x16xf32>
    %cst_83 = arith.constant -1.000000e+30 : f32
    %305 = vector.broadcast %cst_83 : f32 to vector<16x16xf32>
    %306 = arith.select %3, %304, %305 : vector<16x16xi1>, vector<16x16xf32>
    %cst_84 = arith.constant dense<0xFF800000> : vector<16xf32>
    %307 = vector.multi_reduction <maximumf>, %306, %cst_84 [1] : vector<16x16xf32> to vector<16xf32>
    %308 = vector.shape_cast %307 : vector<16xf32> to vector<16x1xf32>
    %309 = vector.broadcast %308 : vector<16x1xf32> to vector<16x16xf32>
    %310 = arith.subf %306, %309 : vector<16x16xf32>
    %311 = math.exp %310 : vector<16x16xf32>
    %cst_85 = arith.constant dense<0.000000e+00> : vector<16xf32>
    %312 = vector.multi_reduction <add>, %311, %cst_85 [1] : vector<16x16xf32> to vector<16xf32>
    %313 = vector.shape_cast %312 : vector<16xf32> to vector<16x1xf32>
    %314 = tpu.reciprocal %313 {approx = true} : vector<16x1xf32> -> vector<16x1xf32>
    %315 = vector.broadcast %314 : vector<16x1xf32> to vector<16x16xf32>
    %316 = arith.mulf %311, %315 : vector<16x16xf32>
    %317 = vector.extract_strided_slice %222 {offsets = [0, 24], sizes = [16, 8], strides = [1, 1]} : vector<16x32xbf16> to vector<16x8xbf16>
    %318 = arith.truncf %316 : vector<16x16xf32> to vector<16x16xbf16>
    %cst_86 = arith.constant dense<0.000000e+00> : vector<16x8xf32>
    %319 = tpu.matmul %318, %317, %cst_86 {dimension_numbers = #tpu.dot_dimension_numbers<[1], [0], [0], [1], [0, 0, 1, 1], [], []>} : vector<16x16xbf16>, vector<16x8xbf16>, vector<16x8xf32> -> vector<16x8xf32>
    %320 = tpu.concatenate %250, %273, %296, %319 in 1 : vector<16x8xf32>, vector<16x8xf32>, vector<16x8xf32>, vector<16x8xf32> -> vector<16x32xf32>
    %c0_87 = arith.constant 0 : index
    %c0_88 = arith.constant 0 : index
    %321 = vector.load %arg10[%c0_87, %c0_88] : memref<1x32xf32, #tpu.memory_space<vmem>>, vector<1x32xf32>
    %322 = vector.broadcast %321 : vector<1x32xf32> to vector<16x32xf32>
    %323 = arith.addf %320, %322 : vector<16x32xf32>
    %cst_89 = arith.constant 0.000000e+00 : f32
    %324 = vector.broadcast %cst_89 : f32 to vector<16x32xf32>
    %325 = arith.maximumf %323, %324 : vector<16x32xf32>
    %cst_90 = arith.constant dense<0.000000e+00> : vector<32xf32>
    %326 = vector.multi_reduction <add>, %325, %cst_90 [0] : vector<16x32xf32> to vector<32xf32>
    %327 = vector.shape_cast %326 : vector<32xf32> to vector<1x32xf32>
    %cst_91 = arith.constant 6.250000e-02 : f32
    %328 = vector.broadcast %cst_91 : f32 to vector<1x32xf32>
    %329 = arith.mulf %327, %328 : vector<1x32xf32>
    %c0_92 = arith.constant 0 : index
    %c0_93 = arith.constant 0 : index
    %330 = vector.load %arg11[%c0_92, %c0_93] : memref<32x20xf32, #tpu.memory_space<vmem>>, vector<32x20xf32>
    %cst_94 = arith.constant dense<0.000000e+00> : vector<1x20xf32>
    %331 = tpu.matmul %329, %330, %cst_94 {dimension_numbers = #tpu.dot_dimension_numbers<[1], [0], [0], [1], [0, 0, 1, 1], [], []>} : vector<1x32xf32>, vector<32x20xf32>, vector<1x20xf32> -> vector<1x20xf32>
    %c0_95 = arith.constant 0 : index
    %c0_96 = arith.constant 0 : index
    %332 = vector.load %arg12[%c0_95, %c0_96] : memref<1x20xf32, #tpu.memory_space<vmem>>, vector<1x20xf32>
    %333 = arith.addf %331, %332 : vector<1x20xf32>
    %cst_97 = arith.constant 0.000000e+00 : f32
    %334 = vector.broadcast %cst_97 : f32 to vector<1x20xf32>
    %335 = arith.maximumf %333, %334 : vector<1x20xf32>
    %c0_98 = arith.constant 0 : index
    %c0_99 = arith.constant 0 : index
    %336 = vector.load %arg13[%c0_98, %c0_99] : memref<20x4xf32, #tpu.memory_space<vmem>>, vector<20x4xf32>
    %cst_100 = arith.constant dense<0.000000e+00> : vector<1x4xf32>
    %337 = tpu.matmul %335, %336, %cst_100 {dimension_numbers = #tpu.dot_dimension_numbers<[1], [0], [0], [1], [0, 0, 1, 1], [], []>} : vector<1x20xf32>, vector<20x4xf32>, vector<1x4xf32> -> vector<1x4xf32>
    %c0_101 = arith.constant 0 : index
    %c0_102 = arith.constant 0 : index
    %338 = vector.load %arg14[%c0_101, %c0_102] : memref<1x4xf32, #tpu.memory_space<vmem>>, vector<1x4xf32>
    %339 = arith.addf %337, %338 : vector<1x4xf32>
    %c0_103 = arith.constant 0 : index
    %c0_104 = arith.constant 0 : index
    %340 = vector.load %arg15[%c0_103, %c0_104] : memref<1x4xf32, #tpu.memory_space<vmem>>, vector<1x4xf32>
    tpu.vector_store %arg15[%c0_103, %c0_104], %339 {strides = array<i32>} : memref<1x4xf32, #tpu.memory_space<vmem>>, vector<1x4xf32>,
    return
  }
}

</mosaic_0001>

<bundles_post_ra>
// kernel: tpu_custom_call.1
= control target key start
LH: loop header
LB: loop body
LE: loop exit
PB: predicated region body
PF: predicated region fallthrough
CT: control target
= control target key end

     0   :  { %vm68_vm0 = vcmask 1043456   ;;  %v2327_v2 = vmov 0.0   ;;  %vm2328_vm1 = vmmov 0   ;;  %vm64_vm2 = vcmask 64512   ;;  %s2816_s0 = inlined_call_operand.vmem [shape: f32[16,8], index: 0, kind: input, shape index: {}]   ;;  %s2817_s1 = inlined_call_operand.vmem [shape: s8[16,16], index: 1, kind: input, shape index: {}]   ;;  %s2818_s2 = inlined_call_operand.vmem [shape: bf16[8,32], index: 2, kind: input, shape index: {}]   ;;  %s2819_s3 = inlined_call_operand.vmem [shape: bf16[32,8], index: 3, kind: input, shape index: {}]   ;;  %s2820_s4 = inlined_call_operand.vmem [shape: f32[1,32], index: 4, kind: input, shape index: {}]   ;;  %s2821_s5 = inlined_call_operand.vmem [shape: bf16[32,32], index: 5, kind: input, shape index: {}]   ;;  %s2822_s6 = inlined_call_operand.vmem [shape: bf16[32,8], index: 6, kind: input, shape index: {}]   ;;  %s2823_s7 = inlined_call_operand.vmem [shape: f32[1,32], index: 7, kind: input, shape index: {}]   ;;  %s2824_s8 = inlined_call_operand.vmem [shape: bf16[32,32], index: 8, kind: input, shape index: {}]   ;;  %s2825_s9 = inlined_call_operand.vmem [shape: bf16[32,8], index: 9, kind: input, shape index: {}]   ;;  %s2826_s10 = inlined_call_operand.vmem [shape: f32[1,32], index: 10, kind: input, shape index: {}]   ;;  %s2827_s11 = inlined_call_operand.vmem [shape: f32[32,20], index: 11, kind: input, shape index: {}]   ;;  %s2828_s12 = inlined_call_operand.vmem [shape: f32[1,20], index: 12, kind: input, shape index: {}]   ;;  %s2829_s13 = inlined_call_operand.vmem [shape: f32[20,4], index: 13, kind: input, shape index: {}]   ;;  %s2830_s14 = inlined_call_operand.vmem [shape: f32[1,4], index: 14, kind: input, shape index: {}]   ;;  %s2831_s15 = inlined_call_operand.hbm [shape: f32[1,4], index: 15, kind: output, shape index: {}]  }
   0x1   :  { %v62_v0 = vld [vmem:[%s2818_s2] sm:$0xf]  ;;  %2012 = vmatprep.subr.bf16.mxu0 %v2327_v2  ;;  %2014 = vmatprep.mubr.msk.bf16.mxu0 %vm2328_vm1, %v2327_v2  ;;  %v61_v4 = vld [vmem:[%s2816_s0 + $0x8] sm:$0xff] }
   0x2   :  { %v60_v1 = vld [vmem:[%s2816_s0] sm:$0xff]  ;;  %v70_v3 = vsel %vm68_vm0, %v62_v0, 0  ;;  %2018 = vmatprep.subr.bf16.mxu1 %v2327_v2  ;;  %2022 = vmatprep.mubr.msk.bf16.mxu1 %vm2328_vm1, %v2327_v2 }
   0x3   :  { %v2197_v5 = vld [vmem:[%s2819_s3] sm:$0xff]   ;;  %2013 = vmatpush3.bf16.msra.mxu0 %v70_v3  ;;  %v63_v6 = vpack.c.bf16 %v61_v4, %v60_v1 }
   0x4   :  { %2019 = vmatpush3.bf16.msra.mxu1 %v2197_v5  ;;  %2026 = vmatprep.subr.bf16.mxu0 %v2327_v2 }
   0x5   :  { %2020 = vmatprep.subr.bf16.mxu1 %v2327_v2 }
   0x6   :  { %2015 = vmatmul.mubr.msk.bf16.vlgmr.msra.gmra.mrb[0].mxu0 %vm64_vm2, %v63_v6 }
   0x7   :  { %2028 = vmatprep.mubr.msk.bf16.mxu0 %vm2328_vm1, %v2327_v2 }
   0x8   :  { %20 = vsyncpa [#allocation3], 0  ;;  %v2198_v7 = vld [vmem:[%s2819_s3 + $0x8] sm:$0xff]   ;;  %v2329_v8 = vmov 0   ;;  %vm130_vm3 = vcmask 261120   ;;  %v2330_v14 = vmov 1   ;;  %v223_v24 = vlaneseq }
   0x9   :  { %2021 = vmatpush3.bf16.msra.mxu1 %v2198_v7  ;;  %2174 = vset.pattern.permute.xlu1 %v2329_v8  ;;  %s2331_s3 = smov 124   ;;  %v2332_v19 = vmov 2   ;;  %v2333_v20 = vmov 3   ;;  %v1959_v28 = vld [vmem:[%s2817_s1] sm:$0xf]   ;;  %vm235_vm5 = vcmask 130048  }
   0xa   :  { %2032 = vmatprep.subr.bf16.mxu1 %v2327_v2  ;;  %2175 = vset.pattern.permute.xlu0 %v2330_v14  ;;  %v224_v27 = vshrl.u32 %v223_v24, 7  ;;  %v1961_v33 = vunpack.c.1.s8 %v1959_v28  ;;  %v1960_v34 = vunpack.c.0.s8 %v1959_v28  ;;  %s2334_s1 = smov 120   ;;  %s2335_s28 = smov 104   ;;  %vm602_vm7 = vcmask 195584  }
   0xb   :  { %s2336_s29 = smov 112   ;;  %s2337_s30 = smov 8   ;;  %vm1831_vm8 = vcmask 162816   ;;  %vm1908_vm9 = vcmask 24576  }
   0xc   :  { %v2472_v31 = vsub.s32 0, %v224_v27  ;;  %v2474_v32 = vsub.s32 1, %v224_v27  ;;  %v2476_v35 = vsub.s32 2, %v224_v27  ;;  %v2480_v40 = vcvt.s32.f32 %v1961_v33  ;;  %s2338_s18 = smov 16   ;;  %s2339_s23 = smov 24  }
   0xd   :  { %v2482_v41 = vcvt.s32.f32 %v1960_v34  ;;  %v2485_v47 = vsub.s32 3, %v224_v27  ;;  %s2341_s26 = smov [#allocation2]  }
   0xe   :  { %vm59_vm4 = vcmp.gt.f32.partialorder %v2480_v40, 0.0  ;;  %s1916_s27 = sshll.u32 %s2341_s26, 4  ;;  %s1917_s27 = int_to_ptr.vmem [resolvable:$true] %s1916_s27 }
   0xf   :  { %vm58_vm6 = vcmp.gt.f32.partialorder %v2482_v41, 0.0  ;;  %p2308_p1 = scmp.lt.s32.totalorder %s1917_s27, %s1917_s27 }
  0xd9   :  { %v106_v9 = vpop.f32.mrb[0].mxu0 }
  0xda   :  { %v2016_v10 = vpop.f32.mrb[1].mxu0 }
  0xdb   :  { %v109_v11 = vpop.f32.mrb[2].mxu0 }
  0xdc   :  { %v2451_v12 = vpack.c.bf16 %v109_v11, %v106_v9  ;;  %v2017_v13 = vpop.f32.mrb[3].mxu0 }
  0xde   :  { %2023 = vmatmul.mubr.msk.bf16.vlgmr.msra.gmra.mrb[0].mxu1 %vm130_vm3, %v2451_v12  ;;  %2027 = vmatpush3.bf16.msra.mxu0 %v2451_v12 }
  0xdf   :  { %2034 = vmatprep.mubr.msk.bf16.mxu1 %vm2328_vm1, %v2327_v2  ;;  %2038 = vmatprep.subr.bf16.mxu0 %v2327_v2 }
 0x1b1   :  { %v168_v15 = vpop.f32.mrb[0].mxu1 }
 0x1b2   :  { %216 = vperm.xlu1 %2174, %v168_v15   ;;  %177 = vrot.lane.b32.xlu0 %v168_v15, %s2331_s3  ;;  %v2024_v16 = vpop.f32.mrb[1].mxu1 }
 0x1b3   :  { %v171_v17 = vpop.f32.mrb[2].mxu1 }
 0x1b4   :  { %v2025_v18 = vpop.f32.mrb[3].mxu1 }
 0x1b6   :  { %2176 = vset.pattern.permute.xlu1 %v2332_v19  ;;  %179 = vrot.lane.b32.xlu0 %v171_v17, %s2331_s3 }
 0x1b7   :  { %395 = vperm.xlu1 %2176, %v168_v15  }
 0x1ba   :  { %304 = vperm.xlu0 %2175, %v168_v15  }
 0x1bb   :  { %2177 = vset.pattern.permute.xlu1 %v2329_v8 }
 0x1bc   :  { %220 = vperm.xlu1 %2177, %v171_v17  }
 0x1be   :  { %2180 = vset.pattern.permute.xlu0 %v2332_v19 }
 0x1bf   :  { %399 = vperm.xlu0 %2180, %v171_v17  }
 0x1c0   :  { %2178 = vset.pattern.permute.xlu1 %v2330_v14 }
 0x1c1   :  { %308 = vperm.xlu1 %2178, %v171_v17  }
 0x1c5   :  { %2179 = vset.pattern.permute.xlu1 %v2333_v20 }
 0x1c6   :  { %485 = vperm.xlu1 %2179, %v168_v15  }
 0x1ca   :  { %489 = vperm.xlu1 %2179, %v171_v17  }
 0x1ce   :  { %2181 = vset.pattern.permute.xlu1 %v2329_v8 }
 0x224   :  { %v178_v21 = vpop.permute.xlu0 %177 }
 0x225   :  { %183 = vxpose.xlu0.b32.start [1/2] (short) (narrow) %v178_v21, 8 }
 0x228   :  { %v180_v22 = vpop.permute.xlu0 %179 }
 0x229   :  { %184 = vxpose.xlu0.b32.end [2/2] (short) (narrow) %v180_v22, 8 }
 0x231   :  { %v217_v23 = vpop.permute.xlu1 %216 }
 0x236   :  { %v396_v25 = vpop.permute.xlu1 %395 }
 0x239   :  { %v305_v26 = vpop.permute.xlu0 %304 }
 0x23b   :  { %v221_v29 = vpop.permute.xlu1 %220 }
 0x23e   :  { %v400_v30 = vpop.permute.xlu0 %399 }
 0x240   :  { %v309_v39 = vpop.permute.xlu1 %308 }
 0x245   :  { %v486_v1 = vpop.permute.xlu1 %485 }
 0x249   :  { %v490_v9 = vpop.permute.xlu1 %489 }
 0x252   :  { %2183 = vset.pattern.permute.xlu0 %v2329_v8 }
 0x2a5   :  { %v199_v36 = vpop.trf.xlu0 }
 0x2a6   :  { %v226_v37 = vrot.slane %v199_v36, %v2472_v31  ;;  %v314_v38 = vrot.slane %v199_v36, %v2474_v32  ;;  %v405_v42 = vrot.slane %v199_v36, %v2476_v35  ;;  %v495_v60 = vrot.slane %v199_v36, %v2485_v47 }
 0x2a8   :  { %v228_v43 = vadd.f32 %v226_v37, %v221_v29  ;;  %v227_v44 = vadd.f32 %v226_v37, %v217_v23  ;;  %v315_v45 = vadd.f32 %v314_v38, %v305_v26  ;;  %v316_v46 = vadd.f32 %v314_v38, %v309_v39 }
 0x2a9   :  { %v406_v51 = vadd.f32 %v405_v42, %v396_v25  ;;  %v407_v0 = vadd.f32 %v405_v42, %v400_v30  ;;  %v496_v7 = vadd.f32 %v495_v60, %v486_v1  ;;  %v497_v16 = vadd.f32 %v495_v60, %v490_v9 }
 0x2aa   :  { %v230_v48 = vmul.f32 0.2, %v228_v43  ;;  %v229_v49 = vmul.f32 0.2, %v227_v44  ;;  %v317_v50 = vmul.f32 0.2, %v315_v45 }
 0x2ab   :  { %v318_v55 = vmul.f32 0.2, %v316_v46  ;;  %v408_v63 = vmul.f32 0.2, %v406_v51  ;;  %v409_v6 = vmul.f32 0.2, %v407_v0 }
 0x2ac   :  { %v232_v52 = vmax.f32 %v228_v43, %v230_v48  ;;  %v231_v53 = vmax.f32 %v227_v44, %v229_v49  ;;  %v319_v54 = vmax.f32 %v315_v45, %v317_v50  ;;  %v498_v15 = vmul.f32 0.2, %v496_v7 }
 0x2ad   :  { %v320_v62 = vmax.f32 %v316_v46, %v318_v55  ;;  %v410_v5 = vmax.f32 %v406_v51, %v408_v63  ;;  %v411_v13 = vmax.f32 %v407_v0, %v409_v6  ;;  %v499_v22 = vmul.f32 0.2, %v497_v16 }
 0x2ae   :  { %v234_v56 = vsel %vm59_vm4, %v232_v52, -1e+30  ;;  %v233_v57 = vsel %vm58_vm6, %v231_v53, -1e+30  ;;  %v321_v61 = vsel %vm58_vm6, %v319_v54, -1e+30  ;;  %v500_v21 = vmax.f32 %v496_v7, %v498_v15 }
 0x2af   :  { %v239_v58 = vsel %vm235_vm5, %v234_v56, -inf  ;;  %v236_v59 = vsel %vm235_vm5, %v233_v57, -inf  ;;  %v323_v3 = vsel %vm235_vm5, %v321_v61, -inf  ;;  %v322_v4 = vsel %vm59_vm4, %v320_v62, -1e+30 }
 0x2b0   :  { %240 = vmax.xlane.f32.xlu0 %v239_v58  ;;  %237 = vmax.xlane.f32.xlu1 %v236_v59  ;;  %v326_v10 = vsel %vm235_vm5, %v322_v4, -inf  ;;  %v412_v11 = vsel %vm58_vm6, %v410_v5, -1e+30  ;;  %v413_v18 = vsel %vm59_vm4, %v411_v13, -1e+30  ;;  %v501_v25 = vmax.f32 %v497_v16, %v499_v22 }
 0x2b1   :  { %v414_v17 = vsel %vm235_vm5, %v412_v11, -inf  ;;  %v417_v23 = vsel %vm235_vm5, %v413_v18, -inf  ;;  %v502_v24 = vsel %vm58_vm6, %v500_v21, -1e+30 }
 0x2b2   :  { %v504_v26 = vsel %vm235_vm5, %v502_v24, -inf  ;;  %v503_v27 = vsel %vm59_vm4, %v501_v25, -1e+30 }
 0x2b3   :  { %v507_v28 = vsel %vm235_vm5, %v503_v27, -inf }
 0x2b4   :  { %324 = vmax.xlane.f32.xlu1 %v323_v3 }
 0x2b8   :  { %327 = vmax.xlane.f32.xlu1 %v326_v10 }
 0x2bc   :  { %415 = vmax.xlane.f32.xlu1 %v414_v17 }
 0x2c0   :  { %418 = vmax.xlane.f32.xlu1 %v417_v23 }
 0x2c4   :  { %505 = vmax.xlane.f32.xlu1 %v504_v26 }
 0x2c8   :  { %508 = vmax.xlane.f32.xlu1 %v507_v28 }
 0x2d9   :  { %347 = vrot.lane.b32.xlu1 %v2451_v12, %s2334_s1 }
 0x33d   :  { %v241_v29 = vpop.xlane.xlu0 %240  ;;  %v238_v30 = vpop.xlane.xlu1 %237 }
 0x33e   :  { %v243_v33 = vsub.f32 %v234_v56, %v241_v29  ;;  %v242_v34 = vsub.f32 %v233_v57, %v238_v30 }
 0x340   :  { %v244_v36 = vmul.f32 1.442695, %v242_v34  ;;  %v246_v37 = vmul.f32 1.442695, %v243_v33 }
 0x341   :  { %v325_v38 = vpop.xlane.xlu1 %324 }
 0x342   :  { %v329_v39 = vsub.f32 %v321_v61, %v325_v38  ;;  %2207 = vpow2.f32 %v244_v36 }
 0x343   :  { %2209 = vpow2.f32 %v246_v37 }
 0x344   :  { %v331_v42 = vmul.f32 1.442695, %v329_v39 }
 0x345   :  { %v328_v43 = vpop.xlane.xlu1 %327 }
 0x346   :  { %v330_v44 = vsub.f32 %v322_v4, %v328_v43  ;;  %2211 = vpow2.f32 %v331_v42 }
 0x348   :  { %v333_v45 = vmul.f32 1.442695, %v330_v44 }
 0x349   :  { %v416_v46 = vpop.xlane.xlu1 %415 }
 0x34a   :  { %v420_v48 = vsub.f32 %v412_v11, %v416_v46  ;;  %2213 = vpow2.f32 %v333_v45 }
 0x34c   :  { %v2208_v49 = vpop.eup %2207  ;;  %v422_v50 = vmul.f32 1.442695, %v420_v48 }
 0x34d   :  { %v419_v51 = vpop.xlane.xlu1 %418  ;;  %v248_v53 = vsel %vm235_vm5, %v2208_v49, 0.0  ;;  %v2210_v54 = vpop.eup %2209 }
 0x34e   :  { %v421_v52 = vsub.f32 %v413_v18, %v419_v51  ;;  %249 = vadd.xlane.f32.xlu1 %v248_v53  ;;  %2215 = vpow2.f32 %v422_v50  ;;  %v251_v58 = vsel %vm235_vm5, %v2210_v54, 0.0 }
 0x350   :  { %v424_v55 = vmul.f32 1.442695, %v421_v52  ;;  %v2212_v59 = vpop.eup %2211 }
 0x351   :  { %v506_v56 = vpop.xlane.xlu1 %505  ;;  %v335_v63 = vsel %vm235_vm5, %v2212_v59, 0.0 }
 0x352   :  { %2217 = vpow2.f32 %v424_v55  ;;  %v510_v57 = vsub.f32 %v502_v24, %v506_v56  ;;  %252 = vadd.xlane.f32.xlu1 %v251_v58 }
 0x354   :  { %v512_v60 = vmul.f32 1.442695, %v510_v57  ;;  %v2214_v0 = vpop.eup %2213 }
 0x355   :  { %v509_v61 = vpop.xlane.xlu1 %508  ;;  %v338_v4 = vsel %vm235_vm5, %v2214_v0, 0.0 }
 0x356   :  { %2219 = vpow2.f32 %v512_v60  ;;  %v511_v62 = vsub.f32 %v503_v27, %v509_v61  ;;  %336 = vadd.xlane.f32.xlu1 %v335_v63  ;;  %v2199_v61 = vld [vmem:[%s2821_s5] sm:$0xff]  }
 0x358   :  { %v514_v1 = vmul.f32 1.442695, %v511_v62  ;;  %v2216_v5 = vpop.eup %2215 }
 0x359   :  { %v348_v3 = vpop.permute.xlu1 %347  ;;  %v426_v9 = vsel %vm235_vm5, %v2216_v5, 0.0 }
 0x35a   :  { %2221 = vpow2.f32 %v514_v1  ;;  %2033 = vmatpush3.bf16.msra.mxu1 %v348_v3  ;;  %339 = vadd.xlane.f32.xlu1 %v338_v4  ;;  %v2200_v1 = vld [vmem:[%s2821_s5 + $0x8] sm:$0xff]   ;;  %v2201_v4 = vld [vmem:[%s2822_s6] sm:$0xff]  }
 0x35b   :  { %2044 = vmatprep.subr.bf16.mxu1 %v2327_v2 }
 0x35c   :  { %v2218_v6 = vpop.eup %2217 }
 0x35d   :  { %v429_v7 = vsel %vm235_vm5, %v2218_v6, 0.0 }
 0x35e   :  { %430 = vadd.xlane.f32.xlu0 %v429_v7  ;;  %427 = vadd.xlane.f32.xlu1 %v426_v9 }
 0x360   :  { %v2220_v10 = vpop.eup %2219 }
 0x361   :  { %v516_v11 = vsel %vm235_vm5, %v2220_v10, 0.0 }
 0x362   :  { %517 = vadd.xlane.f32.xlu1 %v516_v11 }
 0x364   :  { %v2222_v13 = vpop.eup %2221 }
 0x365   :  { %v519_v15 = vsel %vm235_vm5, %v2222_v13, 0.0 }
 0x366   :  { %520 = vadd.xlane.f32.xlu0 %v519_v15 }
 0x373   :  { %527 = vrot.lane.b32.xlu1 %v2451_v12, %s2335_s28 }
 0x37c   :  { %437 = vrot.lane.b32.xlu0 %v2451_v12, %s2336_s29 }
 0x3db   :  { %v250_v16 = vpop.xlane.xlu1 %249 }
 0x3dc   :  { %2223 = vrcp.f32 %v250_v16 }
 0x3df   :  { %v253_v17 = vpop.xlane.xlu1 %252 }
 0x3e0   :  { %2225 = vrcp.f32 %v253_v17  ;;  %v1932_v17 = vld [vmem:[%s2820_s4] ss:$0 sm:$0xff] }
 0x3e3   :  { %v337_v18 = vpop.xlane.xlu1 %336 }
 0x3e4   :  { %2227 = vrcp.f32 %v337_v18 }
 0x3e6   :  { %v2224_v22 = vpop.eup %2223 }
 0x3e7   :  { %v340_v21 = vpop.xlane.xlu1 %339  ;;  %v256_v25 = vmul.f32 %v2224_v22, %v2208_v49 }
 0x3e8   :  { %2229 = vrcp.f32 %v340_v21 }
 0x3ea   :  { %v2226_v23 = vpop.eup %2225 }
 0x3eb   :  { %v431_v24 = vpop.xlane.xlu0 %430  ;;  %v257_v26 = vmul.f32 %v2226_v23, %v2210_v54  ;;  %v428_v27 = vpop.xlane.xlu1 %427 }
 0x3ec   :  { %2231 = vrcp.f32 %v431_v24 }
 0x3ed   :  { %2233 = vrcp.f32 %v428_v27  ;;  %v258_v28 = vpack.c.bf16 %v257_v26, %v256_v25 }
 0x3ee   :  { %v2228_v29 = vpop.eup %2227 }
 0x3ef   :  { %2029 = vmatmul.mubr.msk.bf16.vlgmr.msra.gmra.mrb[4].mxu0 %vm235_vm5, %v258_v28  ;;  %v518_v12 = vpop.xlane.xlu1 %517  ;;  %v343_v34 = vmul.f32 %v2228_v29, %v2212_v59 }
 0x3f0   :  { %2040 = vmatprep.mubr.msk.bf16.mxu0 %vm2328_vm1, %v2327_v2  ;;  %2235 = vrcp.f32 %v518_v12 }
 0x3f2   :  { %v2230_v30 = vpop.eup %2229 }
 0x3f3   :  { %v521_v33 = vpop.xlane.xlu0 %520  ;;  %v344_v36 = vmul.f32 %v2230_v30, %v2214_v0  ;;  %v528_v45 = vpop.permute.xlu1 %527 }
 0x3f4   :  { %2237 = vrcp.f32 %v521_v33  ;;  %v2202_v33 = vld [vmem:[%s2822_s6 + $0x8] sm:$0xff]  }
 0x3f5   :  { %v345_v38 = vpack.c.bf16 %v344_v36, %v343_v34 }
 0x3f6   :  { %v2232_v37 = vpop.eup %2231 }
 0x3f7   :  { %v2234_v39 = vpop.eup %2233  ;;  %v435_v42 = vmul.f32 %v2232_v37, %v2218_v6  ;;  %v438_v43 = vpop.permute.xlu0 %437  ;;  %2035 = vmatmul.mubr.msk.bf16.vlgmr.msra.gmra.mrb[4].mxu1 %vm235_vm5, %v345_v38 }
 0x3f8   :  { %v434_v44 = vmul.f32 %v2234_v39, %v2216_v5  ;;  %2039 = vmatpush3.bf16.msra.mxu0 %v438_v43  ;;  %2045 = vmatpush3.bf16.msra.mxu1 %v528_v45 }
 0x3f9   :  { %2046 = vmatprep.mubr.msk.bf16.mxu1 %vm2328_vm1, %v2327_v2  ;;  %2050 = vmatprep.subr.bf16.mxu0 %v2327_v2 }
 0x3fa   :  { %v436_v46 = vpack.c.bf16 %v435_v42, %v434_v44  ;;  %2058 = vmatprep.subr.bf16.mxu1 %v2327_v2  ;;  %v2236_v48 = vpop.eup %2235 }
 0x3fb   :  { %v524_v50 = vmul.f32 %v2236_v48, %v2220_v10 }
 0x3fc   :  { %2041 = vmatmul.mubr.msk.bf16.vlgmr.msra.gmra.mrb[8].mxu0 %vm235_vm5, %v436_v46 }
 0x3fd   :  { %2054 = vmatprep.mubr.msk.bf16.mxu0 %vm2328_vm1, %v2327_v2  ;;  %2051 = vmatpush3.bf16.msra.mxu0 %v2199_v61 }
 0x3fe   :  { %v2238_v49 = vpop.eup %2237  ;;  %2052 = vmatprep.subr.bf16.mxu0 %v2327_v2 }
 0x3ff   :  { %v525_v51 = vmul.f32 %v2238_v49, %v2222_v13 }
 0x401   :  { %v526_v52 = vpack.c.bf16 %v525_v51, %v524_v50  ;;  %2053 = vmatpush3.bf16.msra.mxu0 %v2200_v1 }
 0x402   :  { %2066 = vmatprep.subr.bf16.mxu0 %v2327_v2 }
 0x403   :  { %2047 = vmatmul.mubr.msk.bf16.vlgmr.msra.gmra.mrb[8].mxu1 %vm235_vm5, %v526_v52 }
 0x404   :  { %2062 = vmatprep.mubr.msk.bf16.mxu1 %vm2328_vm1, %v2327_v2  ;;  %2059 = vmatpush3.bf16.msra.mxu1 %v2201_v4 }
 0x405   :  { %2060 = vmatprep.subr.bf16.mxu1 %v2327_v2 }
 0x408   :  { %2061 = vmatpush3.bf16.msra.mxu1 %v2202_v33 }
 0x409   :  { %2072 = vmatprep.subr.bf16.mxu1 %v2327_v2 }
 0x4c2   :  { %v296_v53 = vpop.f32.mrb[4].mxu0 }
 0x4c3   :  { %v2030_v54 = vpop.f32.mrb[5].mxu0 }
 0x4c4   :  { %v299_v55 = vpop.f32.mrb[6].mxu0 }
 0x4c5   :  { %v2031_v56 = vpop.f32.mrb[7].mxu0 }
 0x4ca   :  { %v387_v57 = vpop.f32.mrb[4].mxu1 }
 0x4cb   :  { %576 = vrot.lane.b32.xlu1 %v387_v57, %s2337_s30  ;;  %v2036_v58 = vpop.f32.mrb[5].mxu1 }
 0x4cc   :  { %v390_v59 = vpop.f32.mrb[6].mxu1 }
 0x4cd   :  { %578 = vrot.lane.b32.xlu0 %v390_v59, %s2337_s30  ;;  %v2037_v60 = vpop.f32.mrb[7].mxu1 }
 0x4cf   :  { %v477_v62 = vpop.f32.mrb[8].mxu0 }
 0x4d0   :  { %584 = vrot.lane.b32.xlu1 %v477_v62, %s2338_s18  ;;  %v2042_v63 = vpop.f32.mrb[9].mxu0 }
 0x4d1   :  { %v480_v0 = vpop.f32.mrb[10].mxu0 }
 0x4d2   :  { %586 = vrot.lane.b32.xlu0 %v480_v0, %s2338_s18  ;;  %v2043_v3 = vpop.f32.mrb[11].mxu0 }
 0x4d6   :  { %v567_v5 = vpop.f32.mrb[8].mxu1 }
 0x4d7   :  { %592 = vrot.lane.b32.xlu1 %v567_v5, %s2339_s23  ;;  %v2048_v6 = vpop.f32.mrb[9].mxu1 }
 0x4d8   :  { %v570_v7 = vpop.f32.mrb[10].mxu1 }
 0x4d9   :  { %594 = vrot.lane.b32.xlu0 %v570_v7, %s2339_s23  ;;  %v2049_v9 = vpop.f32.mrb[11].mxu1 }
 0x53d   :  { %v577_v10 = vpop.permute.xlu1 %576 }
 0x53e   :  { %v598_v16 = vsel %vm64_vm2, %v296_v53, %v577_v10 }
 0x53f   :  { %v579_v11 = vpop.permute.xlu0 %578 }
 0x540   :  { %v599_v22 = vsel %vm64_vm2, %v299_v55, %v579_v11 }
 0x542   :  { %v585_v13 = vpop.permute.xlu1 %584 }
 0x543   :  { %v600_v18 = vsel %vm235_vm5, %v598_v16, %v585_v13 }
 0x544   :  { %v587_v15 = vpop.permute.xlu0 %586 }
 0x545   :  { %v601_v24 = vsel %vm235_vm5, %v599_v22, %v587_v15 }
 0x549   :  { %v593_v21 = vpop.permute.xlu1 %592 }
 0x54a   :  { %v603_v23 = vsel %vm602_vm7, %v600_v18, %v593_v21 }
 0x54b   :  { %v612_v25 = vadd.f32 %v1932_v17, %v603_v23  ;;  %v595_v26 = vpop.permute.xlu0 %594 }
 0x54c   :  { %v604_v27 = vsel %vm602_vm7, %v601_v24, %v595_v26 }
 0x54d   :  { %v613_v28 = vadd.f32 %v1932_v17, %v604_v27  ;;  %v614_v12 = vmax.f32 %v612_v25, 0.0 }
 0x54f   :  { %v615_v29 = vmax.f32 %v613_v28, 0.0 }
 0x551   :  { %v620_v30 = vpack.c.bf16 %v615_v29, %v614_v12 }
 0x553   :  { %2055 = vmatmul.mubr.msk.bf16.vlgmr.msra.gmra.mrb[12].mxu0 %vm130_vm3, %v620_v30 }
 0x554   :  { %2068 = vmatprep.mubr.msk.bf16.mxu0 %vm2328_vm1, %v2327_v2 }
 0x626   :  { %v670_v34 = vpop.f32.mrb[12].mxu0 }
 0x627   :  { %v2056_v36 = vpop.f32.mrb[13].mxu0 }
 0x628   :  { %v673_v37 = vpop.f32.mrb[14].mxu0 }
 0x629   :  { %v2577_v38 = vpack.c.bf16 %v673_v37, %v670_v34  ;;  %v2057_v39 = vpop.f32.mrb[15].mxu0 }
 0x62b   :  { %2063 = vmatmul.mubr.msk.bf16.vlgmr.msra.gmra.mrb[12].mxu1 %vm130_vm3, %v2577_v38  ;;  %2067 = vmatpush3.bf16.msra.mxu0 %v2577_v38 }
 0x62c   :  { %2074 = vmatprep.mubr.msk.bf16.mxu1 %vm2328_vm1, %v2327_v2  ;;  %2078 = vmatprep.subr.bf16.mxu0 %v2327_v2 }
 0x6fe   :  { %v731_v42 = vpop.f32.mrb[12].mxu1 }
 0x6ff   :  { %740 = vrot.lane.b32.xlu1 %v731_v42, %s2331_s3  ;;  %v2064_v43 = vpop.f32.mrb[13].mxu1 }
 0x700   :  { %v734_v44 = vpop.f32.mrb[14].mxu1 }
 0x701   :  { %742 = vrot.lane.b32.xlu0 %v734_v44, %s2331_s3  ;;  %v2065_v45 = vpop.f32.mrb[15].mxu1 }
 0x703   :  { %779 = vperm.xlu1 %2181, %v731_v42  }
 0x705   :  { %783 = vperm.xlu0 %2183, %v734_v44  }
 0x707   :  { %2182 = vset.pattern.permute.xlu1 %v2330_v14 }
 0x708   :  { %866 = vperm.xlu1 %2182, %v731_v42  }
 0x709   :  { %2184 = vset.pattern.permute.xlu0 %v2332_v19 }
 0x70a   :  { %957 = vperm.xlu0 %2184, %v731_v42  }
 0x70c   :  { %2185 = vset.pattern.permute.xlu1 %v2333_v20 }
 0x70d   :  { %1047 = vperm.xlu1 %2185, %v731_v42  }
 0x70e   :  { %2188 = vset.pattern.permute.xlu0 %v2333_v20 }
 0x70f   :  { %1051 = vperm.xlu0 %2188, %v734_v44  }
 0x711   :  { %2186 = vset.pattern.permute.xlu1 %v2330_v14 }
 0x712   :  { %870 = vperm.xlu1 %2186, %v734_v44  }
 0x713   :  { %2191 = vset.pattern.permute.xlu0 %v2329_v8 }
 0x716   :  { %2187 = vset.pattern.permute.xlu1 %v2332_v19 }
 0x717   :  { %961 = vperm.xlu1 %2187, %v734_v44  }
 0x771   :  { %v741_v46 = vpop.permute.xlu1 %740 }
 0x772   :  { %746 = vxpose.xlu1.b32.start [1/2] (short) (narrow) %v741_v46, 8 }
 0x773   :  { %v743_v48 = vpop.permute.xlu0 %742 }
 0x776   :  { %747 = vxpose.xlu1.b32.end [2/2] (short) (narrow) %v743_v48, 8 }
 0x782   :  { %v780_v49 = vpop.permute.xlu1 %779 }
 0x784   :  { %v784_v54 = vpop.permute.xlu0 %783 }
 0x787   :  { %v867_v50 = vpop.permute.xlu1 %866 }
 0x789   :  { %v958_v63 = vpop.permute.xlu0 %957 }
 0x78c   :  { %v1048_v51 = vpop.permute.xlu1 %1047 }
 0x78e   :  { %v1052_v27 = vpop.permute.xlu0 %1051 }
 0x791   :  { %v871_v52 = vpop.permute.xlu1 %870 }
 0x794   :  { %2189 = vset.pattern.permute.xlu1 %v2329_v8 }
 0x796   :  { %v962_v53 = vpop.permute.xlu1 %961 }
 0x7f2   :  { %v762_v55 = vpop.trf.xlu1 }
 0x7f3   :  { %v789_v56 = vrot.slane %v762_v55, %v2472_v31  ;;  %v876_v57 = vrot.slane %v762_v55, %v2474_v32  ;;  %v967_v58 = vrot.slane %v762_v55, %v2476_v35  ;;  %v1057_v11 = vrot.slane %v762_v55, %v2485_v47 }
 0x7f5   :  { %v878_v59 = vadd.f32 %v876_v57, %v871_v52  ;;  %v790_v60 = vadd.f32 %v789_v56, %v780_v49  ;;  %v791_v61 = vadd.f32 %v789_v56, %v784_v54  ;;  %v877_v62 = vadd.f32 %v876_v57, %v867_v50 }
 0x7f6   :  { %v968_v3 = vadd.f32 %v967_v58, %v958_v63  ;;  %v969_v21 = vadd.f32 %v967_v58, %v962_v53  ;;  %v1058_v26 = vadd.f32 %v1057_v11, %v1048_v51  ;;  %v1059_v33 = vadd.f32 %v1057_v11, %v1052_v27 }
 0x7f7   :  { %v880_v0 = vmul.f32 0.2, %v878_v59  ;;  %v792_v8 = vmul.f32 0.2, %v790_v60  ;;  %v793_v1 = vmul.f32 0.2, %v791_v61 }
 0x7f8   :  { %v879_v7 = vmul.f32 0.2, %v877_v62  ;;  %v970_v18 = vmul.f32 0.2, %v968_v3  ;;  %v971_v25 = vmul.f32 0.2, %v969_v21 }
 0x7f9   :  { %v882_v4 = vmax.f32 %v878_v59, %v880_v0  ;;  %v794_v5 = vmax.f32 %v790_v60, %v792_v8  ;;  %v795_v6 = vmax.f32 %v791_v61, %v793_v1  ;;  %v1060_v30 = vmul.f32 0.2, %v1058_v26 }
 0x7fa   :  { %v881_v17 = vmax.f32 %v877_v62, %v879_v7  ;;  %v972_v24 = vmax.f32 %v968_v3, %v970_v18  ;;  %v973_v29 = vmax.f32 %v969_v21, %v971_v25  ;;  %v1061_v39 = vmul.f32 0.2, %v1059_v33 }
 0x7fb   :  { %v884_v9 = vsel %vm59_vm4, %v882_v4, -1e+30  ;;  %v796_v10 = vsel %vm58_vm6, %v794_v5, -1e+30  ;;  %v797_v16 = vsel %vm59_vm4, %v795_v6, -1e+30  ;;  %v1062_v37 = vmax.f32 %v1058_v26, %v1060_v30 }
 0x7fc   :  { %v888_v13 = vsel %vm235_vm5, %v884_v9, -inf  ;;  %v798_v15 = vsel %vm235_vm5, %v796_v10, -inf  ;;  %v801_v22 = vsel %vm235_vm5, %v797_v16, -inf  ;;  %v883_v23 = vsel %vm58_vm6, %v881_v17, -1e+30 }
 0x7fd   :  { %889 = vmax.xlane.f32.xlu1 %v888_v13  ;;  %799 = vmax.xlane.f32.xlu0 %v798_v15  ;;  %v885_v28 = vsel %vm235_vm5, %v883_v23, -inf  ;;  %v974_v12 = vsel %vm58_vm6, %v972_v24, -1e+30  ;;  %v975_v36 = vsel %vm59_vm4, %v973_v29, -1e+30  ;;  %v1063_v44 = vmax.f32 %v1059_v33, %v1061_v39 }
 0x7fe   :  { %v976_v34 = vsel %vm235_vm5, %v974_v12, -inf  ;;  %v979_v42 = vsel %vm235_vm5, %v975_v36, -inf  ;;  %v1064_v43 = vsel %vm58_vm6, %v1062_v37, -1e+30 }
 0x7ff   :  { %v1066_v45 = vsel %vm235_vm5, %v1064_v43, -inf  ;;  %v1065_v46 = vsel %vm59_vm4, %v1063_v44, -1e+30 }
 0x800   :  { %v1069_v48 = vsel %vm235_vm5, %v1065_v46, -inf }
 0x801   :  { %802 = vmax.xlane.f32.xlu0 %v801_v22 }
 0x805   :  { %886 = vmax.xlane.f32.xlu0 %v885_v28 }
 0x809   :  { %977 = vmax.xlane.f32.xlu0 %v976_v34 }
 0x80d   :  { %980 = vmax.xlane.f32.xlu0 %v979_v42 }
 0x80e   :  { %909 = vrot.lane.b32.xlu1 %v2577_v38, %s2334_s1 }
 0x811   :  { %1067 = vmax.xlane.f32.xlu0 %v1066_v45 }
 0x815   :  { %1070 = vmax.xlane.f32.xlu0 %v1069_v48 }
 0x88a   :  { %v890_v49 = vpop.xlane.xlu1 %889  ;;  %v800_v50 = vpop.xlane.xlu0 %799 }
 0x88b   :  { %v804_v51 = vsub.f32 %v796_v10, %v800_v50  ;;  %v892_v57 = vsub.f32 %v884_v9, %v890_v49 }
 0x88d   :  { %v806_v52 = vmul.f32 1.442695, %v804_v51  ;;  %v895_v61 = vmul.f32 1.442695, %v892_v57 }
 0x88e   :  { %v910_v53 = vpop.permute.xlu1 %909  ;;  %v803_v54 = vpop.xlane.xlu0 %802 }
 0x88f   :  { %v805_v55 = vsub.f32 %v797_v16, %v803_v54  ;;  %2073 = vmatpush3.bf16.msra.mxu1 %v910_v53  ;;  %2239 = vpow2.f32 %v806_v52 }
 0x890   :  { %2084 = vmatprep.subr.bf16.mxu1 %v2327_v2 }
 0x891   :  { %v808_v56 = vmul.f32 1.442695, %v805_v55 }
 0x892   :  { %v887_v58 = vpop.xlane.xlu0 %886 }
 0x893   :  { %2241 = vpow2.f32 %v808_v56  ;;  %v891_v59 = vsub.f32 %v883_v23, %v887_v58 }
 0x895   :  { %v893_v60 = vmul.f32 1.442695, %v891_v59 }
 0x896   :  { %v978_v62 = vpop.xlane.xlu0 %977 }
 0x897   :  { %2243 = vpow2.f32 %v893_v60  ;;  %v982_v63 = vsub.f32 %v974_v12, %v978_v62 }
 0x898   :  { %2245 = vpow2.f32 %v895_v61 }
 0x899   :  { %v2240_v0 = vpop.eup %2239  ;;  %v984_v8 = vmul.f32 1.442695, %v982_v63 }
 0x89a   :  { %v981_v1 = vpop.xlane.xlu0 %980  ;;  %v810_v4 = vsel %vm235_vm5, %v2240_v0, 0.0 }
 0x89b   :  { %v983_v3 = vsub.f32 %v975_v36, %v981_v1  ;;  %811 = vadd.xlane.f32.xlu0 %v810_v4  ;;  %2247 = vpow2.f32 %v984_v8 }
 0x89d   :  { %v2242_v5 = vpop.eup %2241  ;;  %v986_v6 = vmul.f32 1.442695, %v983_v3 }
 0x89e   :  { %v1068_v7 = vpop.xlane.xlu0 %1067  ;;  %v813_v9 = vsel %vm235_vm5, %v2242_v5, 0.0 }
 0x89f   :  { %v1072_v10 = vsub.f32 %v1064_v43, %v1068_v7  ;;  %814 = vadd.xlane.f32.xlu0 %v813_v9  ;;  %2249 = vpow2.f32 %v986_v6 }
 0x8a1   :  { %v2244_v11 = vpop.eup %2243  ;;  %v1074_v13 = vmul.f32 1.442695, %v1072_v10 }
 0x8a2   :  { %v1071_v15 = vpop.xlane.xlu0 %1070  ;;  %v897_v16 = vsel %vm235_vm5, %v2244_v11, 0.0  ;;  %v2246_v18 = vpop.eup %2245 }
 0x8a3   :  { %2251 = vpow2.f32 %v1074_v13  ;;  %v1073_v17 = vsub.f32 %v1065_v46, %v1071_v15  ;;  %898 = vadd.xlane.f32.xlu0 %v897_v16  ;;  %v900_v22 = vsel %vm235_vm5, %v2246_v18, 0.0  ;;  %v2204_v13 = vld [vmem:[%s2824_s8 + $0x8] sm:$0xff]  }
 0x8a5   :  { %v1076_v21 = vmul.f32 1.442695, %v1073_v17  ;;  %v2248_v23 = vpop.eup %2247  ;;  %v2205_v17 = vld [vmem:[%s2825_s9] sm:$0xff]  }
 0x8a6   :  { %v988_v24 = vsel %vm235_vm5, %v2248_v23, 0.0 }
 0x8a7   :  { %2253 = vpow2.f32 %v1076_v21  ;;  %901 = vadd.xlane.f32.xlu0 %v900_v22 }
 0x8a9   :  { %v2250_v25 = vpop.eup %2249 }
 0x8aa   :  { %v991_v28 = vsel %vm235_vm5, %v2250_v25, 0.0 }
 0x8ab   :  { %989 = vadd.xlane.f32.xlu0 %v988_v24 }
 0x8ad   :  { %v2252_v26 = vpop.eup %2251 }
 0x8ae   :  { %v1078_v27 = vsel %vm235_vm5, %v2252_v26, 0.0 }
 0x8af   :  { %1079 = vadd.xlane.f32.xlu1 %v1078_v27  ;;  %992 = vadd.xlane.f32.xlu0 %v991_v28 }
 0x8b1   :  { %v2254_v12 = vpop.eup %2253 }
 0x8b2   :  { %v1081_v29 = vsel %vm235_vm5, %v2254_v12, 0.0 }
 0x8b3   :  { %1082 = vadd.xlane.f32.xlu0 %v1081_v29 }
 0x8c0   :  { %1089 = vrot.lane.b32.xlu1 %v2577_v38, %s2335_s28 }
 0x8c9   :  { %999 = vrot.lane.b32.xlu0 %v2577_v38, %s2336_s29 }
 0x928   :  { %v812_v30 = vpop.xlane.xlu0 %811 }
 0x929   :  { %2255 = vrcp.f32 %v812_v30  ;;  %v1943_v30 = vld [vmem:[%s2823_s7] ss:$0 sm:$0xff] }
 0x92c   :  { %v815_v33 = vpop.xlane.xlu0 %814 }
 0x92d   :  { %2257 = vrcp.f32 %v815_v33 }
 0x930   :  { %v899_v34 = vpop.xlane.xlu0 %898 }
 0x931   :  { %2259 = vrcp.f32 %v899_v34 }
 0x933   :  { %v2256_v37 = vpop.eup %2255 }
 0x934   :  { %v902_v36 = vpop.xlane.xlu0 %901  ;;  %v818_v42 = vmul.f32 %v2256_v37, %v2240_v0 }
 0x935   :  { %2261 = vrcp.f32 %v902_v36 }
 0x937   :  { %v2258_v39 = vpop.eup %2257 }
 0x938   :  { %v819_v43 = vmul.f32 %v2258_v39, %v2242_v5  ;;  %v990_v44 = vpop.xlane.xlu0 %989 }
 0x939   :  { %2263 = vrcp.f32 %v990_v44 }
 0x93a   :  { %v820_v45 = vpack.c.bf16 %v819_v43, %v818_v42 }
 0x93b   :  { %v2260_v38 = vpop.eup %2259 }
 0x93c   :  { %v1080_v46 = vpop.xlane.xlu1 %1079  ;;  %2069 = vmatmul.mubr.msk.bf16.vlgmr.msra.gmra.mrb[16].mxu0 %vm235_vm5, %v820_v45  ;;  %v993_v48 = vpop.xlane.xlu0 %992  ;;  %v905_v50 = vmul.f32 %v2260_v38, %v2244_v11  ;;  %v2203_v11 = vld [vmem:[%s2824_s8] sm:$0xff]  }
 0x93d   :  { %2265 = vrcp.f32 %v993_v48  ;;  %2080 = vmatprep.mubr.msk.bf16.mxu0 %vm2328_vm1, %v2327_v2 }
 0x93e   :  { %2267 = vrcp.f32 %v1080_v46 }
 0x93f   :  { %v2262_v49 = vpop.eup %2261 }
 0x940   :  { %v906_v51 = vmul.f32 %v2262_v49, %v2246_v18  ;;  %v1083_v52 = vpop.xlane.xlu0 %1082  ;;  %v1090_v54 = vpop.permute.xlu1 %1089  ;;  %v2206_v49 = vld [vmem:[%s2825_s9 + $0x8] sm:$0xff]  }
 0x941   :  { %2269 = vrcp.f32 %v1083_v52 }
 0x942   :  { %v907_v53 = vpack.c.bf16 %v906_v51, %v905_v50 }
 0x943   :  { %v2264_v56 = vpop.eup %2263 }
 0x944   :  { %2075 = vmatmul.mubr.msk.bf16.vlgmr.msra.gmra.mrb[16].mxu1 %vm235_vm5, %v907_v53  ;;  %v1000_v55 = vpop.permute.xlu0 %999  ;;  %v996_v58 = vmul.f32 %v2264_v56, %v2248_v23 }
 0x945   :  { %2085 = vmatpush3.bf16.msra.mxu1 %v1090_v54  ;;  %2079 = vmatpush3.bf16.msra.mxu0 %v1000_v55 }
 0x946   :  { %2086 = vmatprep.mubr.msk.bf16.mxu1 %vm2328_vm1, %v2327_v2  ;;  %2090 = vmatprep.subr.bf16.mxu0 %v2327_v2 }
 0x947   :  { %v2266_v57 = vpop.eup %2265  ;;  %2098 = vmatprep.subr.bf16.mxu1 %v2327_v2 }
 0x948   :  { %v997_v59 = vmul.f32 %v2266_v57, %v2250_v25  ;;  %v2268_v60 = vpop.eup %2267 }
 0x949   :  { %v1086_v63 = vmul.f32 %v2268_v60, %v2252_v26 }
 0x94a   :  { %v998_v61 = vpack.c.bf16 %v997_v59, %v996_v58 }
 0x94b   :  { %v2270_v62 = vpop.eup %2269 }
 0x94c   :  { %v1087_v0 = vmul.f32 %v2270_v62, %v2254_v12  ;;  %2081 = vmatmul.mubr.msk.bf16.vlgmr.msra.gmra.mrb[20].mxu0 %vm235_vm5, %v998_v61 }
 0x94d   :  { %2094 = vmatprep.mubr.msk.bf16.mxu0 %vm2328_vm1, %v2327_v2  ;;  %2091 = vmatpush3.bf16.msra.mxu0 %v2203_v11 }
 0x94e   :  { %v1088_v8 = vpack.c.bf16 %v1087_v0, %v1086_v63  ;;  %2092 = vmatprep.subr.bf16.mxu0 %v2327_v2 }
 0x950   :  { %2087 = vmatmul.mubr.msk.bf16.vlgmr.msra.gmra.mrb[20].mxu1 %vm235_vm5, %v1088_v8 }
 0x951   :  { %2102 = vmatprep.mubr.msk.bf16.mxu1 %vm2328_vm1, %v2327_v2  ;;  %2093 = vmatpush3.bf16.msra.mxu0 %v2204_v13 }
 0x952   :  { %2106 = vmatprep.subr.bf16.mxu0 %v2327_v2  ;;  %2099 = vmatpush3.bf16.msra.mxu1 %v2205_v17 }
 0x953   :  { %2100 = vmatprep.subr.bf16.mxu1 %v2327_v2 }
 0x956   :  { %2101 = vmatpush3.bf16.msra.mxu1 %v2206_v49 }
 0x957   :  { %2112 = vmatprep.subr.bf16.mxu1 %v2327_v2 }
 0xa0f   :  { %v858_v1 = vpop.f32.mrb[16].mxu0 }
 0xa10   :  { %v2070_v3 = vpop.f32.mrb[17].mxu0 }
 0xa11   :  { %v861_v4 = vpop.f32.mrb[18].mxu0 }
 0xa12   :  { %v2071_v5 = vpop.f32.mrb[19].mxu0 }
 0xa17   :  { %v949_v6 = vpop.f32.mrb[16].mxu1 }
 0xa18   :  { %1138 = vrot.lane.b32.xlu1 %v949_v6, %s2337_s30  ;;  %v2076_v7 = vpop.f32.mrb[17].mxu1 }
 0xa19   :  { %v952_v9 = vpop.f32.mrb[18].mxu1 }
 0xa1a   :  { %1140 = vrot.lane.b32.xlu0 %v952_v9, %s2337_s30  ;;  %v2077_v10 = vpop.f32.mrb[19].mxu1 }
 0xa1f   :  { %v1039_v15 = vpop.f32.mrb[20].mxu0 }
 0xa20   :  { %1146 = vrot.lane.b32.xlu1 %v1039_v15, %s2338_s18  ;;  %v2082_v16 = vpop.f32.mrb[21].mxu0 }
 0xa21   :  { %v1042_v18 = vpop.f32.mrb[22].mxu0 }
 0xa22   :  { %1148 = vrot.lane.b32.xlu0 %v1042_v18, %s2338_s18  ;;  %v2083_v21 = vpop.f32.mrb[23].mxu0 }
 0xa23   :  { %v1129_v22 = vpop.f32.mrb[20].mxu1 }
 0xa24   :  { %v2088_v23 = vpop.f32.mrb[21].mxu1  ;;  %1154 = vrot.lane.b32.xlu1 %v1129_v22, %s2339_s23 }
 0xa25   :  { %v1132_v24 = vpop.f32.mrb[22].mxu1 }
 0xa26   :  { %v2089_v25 = vpop.f32.mrb[23].mxu1  ;;  %1156 = vrot.lane.b32.xlu0 %v1132_v24, %s2339_s23 }
 0xa8a   :  { %v1139_v26 = vpop.permute.xlu1 %1138 }
 0xa8b   :  { %v1160_v29 = vsel %vm64_vm2, %v858_v1, %v1139_v26 }
 0xa8c   :  { %v1141_v27 = vpop.permute.xlu0 %1140 }
 0xa8d   :  { %v1161_v36 = vsel %vm64_vm2, %v861_v4, %v1141_v27 }
 0xa92   :  { %v1147_v28 = vpop.permute.xlu1 %1146 }
 0xa93   :  { %v1162_v33 = vsel %vm235_vm5, %v1160_v29, %v1147_v28 }
 0xa94   :  { %v1149_v12 = vpop.permute.xlu0 %1148 }
 0xa95   :  { %v1163_v39 = vsel %vm235_vm5, %v1161_v36, %v1149_v12 }
 0xa96   :  { %v1155_v34 = vpop.permute.xlu1 %1154 }
 0xa97   :  { %v1164_v37 = vsel %vm602_vm7, %v1162_v33, %v1155_v34 }
 0xa98   :  { %v1173_v42 = vadd.f32 %v1943_v30, %v1164_v37  ;;  %v1157_v43 = vpop.permute.xlu0 %1156 }
 0xa99   :  { %v1165_v44 = vsel %vm602_vm7, %v1163_v39, %v1157_v43 }
 0xa9a   :  { %v1174_v45 = vadd.f32 %v1943_v30, %v1165_v44  ;;  %v1175_v46 = vmax.f32 %v1173_v42, 0.0 }
 0xa9c   :  { %v1176_v48 = vmax.f32 %v1174_v45, 0.0 }
 0xa9e   :  { %v1181_v38 = vpack.c.bf16 %v1176_v48, %v1175_v46 }
 0xaa0   :  { %2095 = vmatmul.mubr.msk.bf16.vlgmr.msra.gmra.mrb[24].mxu0 %vm130_vm3, %v1181_v38 }
 0xaa1   :  { %2108 = vmatprep.mubr.msk.bf16.mxu0 %vm2328_vm1, %v2327_v2 }
 0xb73   :  { %v1231_v50 = vpop.f32.mrb[24].mxu0 }
 0xb74   :  { %v2096_v51 = vpop.f32.mrb[25].mxu0 }
 0xb75   :  { %v1234_v52 = vpop.f32.mrb[26].mxu0 }
 0xb76   :  { %v2686_v53 = vpack.c.bf16 %v1234_v52, %v1231_v50  ;;  %v2097_v54 = vpop.f32.mrb[27].mxu0 }
 0xb78   :  { %2103 = vmatmul.mubr.msk.bf16.vlgmr.msra.gmra.mrb[24].mxu1 %vm130_vm3, %v2686_v53  ;;  %2107 = vmatpush3.bf16.msra.mxu0 %v2686_v53 }
 0xb79   :  { %2114 = vmatprep.mubr.msk.bf16.mxu1 %vm2328_vm1, %v2327_v2  ;;  %2118 = vmatprep.subr.bf16.mxu0 %v2327_v2 }
 0xc4b   :  { %v1292_v55 = vpop.f32.mrb[24].mxu1 }
 0xc4c   :  { %1301 = vrot.lane.b32.xlu1 %v1292_v55, %s2331_s3  ;;  %v2104_v56 = vpop.f32.mrb[25].mxu1 }
 0xc4d   :  { %v1295_v57 = vpop.f32.mrb[26].mxu1 }
 0xc4e   :  { %1303 = vrot.lane.b32.xlu0 %v1295_v57, %s2331_s3  ;;  %v2105_v58 = vpop.f32.mrb[27].mxu1 }
 0xc50   :  { %1340 = vperm.xlu1 %2189, %v1292_v55  }
 0xc52   :  { %1344 = vperm.xlu0 %2191, %v1295_v57  }
 0xc54   :  { %2190 = vset.pattern.permute.xlu1 %v2330_v14 }
 0xc55   :  { %1427 = vperm.xlu1 %2190, %v1292_v55  }
 0xc56   :  { %2192 = vset.pattern.permute.xlu0 %v2332_v19 }
 0xc57   :  { %1518 = vperm.xlu0 %2192, %v1292_v55  }
 0xc59   :  { %2193 = vset.pattern.permute.xlu1 %v2333_v20 }
 0xc5a   :  { %1608 = vperm.xlu1 %2193, %v1292_v55  }
 0xc5b   :  { %2196 = vset.pattern.permute.xlu0 %v2333_v20 }
 0xc5c   :  { %1612 = vperm.xlu0 %2196, %v1295_v57  }
 0xc5e   :  { %2194 = vset.pattern.permute.xlu1 %v2330_v14 }
 0xc5f   :  { %1431 = vperm.xlu1 %2194, %v1295_v57  }
 0xc63   :  { %2195 = vset.pattern.permute.xlu1 %v2332_v19 }
 0xc64   :  { %1522 = vperm.xlu1 %2195, %v1295_v57  }
 0xcbe   :  { %v1302_v59 = vpop.permute.xlu1 %1301 }
 0xcbf   :  { %1307 = vxpose.xlu1.b32.start [1/2] (short) (narrow) %v1302_v59, 8 }
 0xcc0   :  { %v1304_v60 = vpop.permute.xlu0 %1303 }
 0xcc3   :  { %1308 = vxpose.xlu1.b32.end [2/2] (short) (narrow) %v1304_v60, 8 }
 0xccf   :  { %v1341_v61 = vpop.permute.xlu1 %1340 }
 0xcd1   :  { %v1345_v1 = vpop.permute.xlu0 %1344 }
 0xcd4   :  { %v1428_v62 = vpop.permute.xlu1 %1427 }
 0xcd6   :  { %v1519_v9 = vpop.permute.xlu0 %1518 }
 0xcd9   :  { %v1609_v63 = vpop.permute.xlu1 %1608 }
 0xcdb   :  { %v1613_v33 = vpop.permute.xlu0 %1612 }
 0xcde   :  { %v1432_v0 = vpop.permute.xlu1 %1431 }
 0xce3   :  { %v1523_v8 = vpop.permute.xlu1 %1522 }
 0xd3f   :  { %v1323_v3 = vpop.trf.xlu1 }
 0xd40   :  { %v1350_v20 = vrot.slane %v1323_v3, %v2472_v31  ;;  %v1437_v4 = vrot.slane %v1323_v3, %v2474_v32  ;;  %v1528_v14 = vrot.slane %v1323_v3, %v2476_v35  ;;  %v1618_v35 = vrot.slane %v1323_v3, %v2485_v47 }
 0xd42   :  { %v1439_v5 = vadd.f32 %v1437_v4, %v1432_v0  ;;  %v1351_v19 = vadd.f32 %v1350_v20, %v1341_v61  ;;  %v1352_v6 = vadd.f32 %v1350_v20, %v1345_v1  ;;  %v1438_v7 = vadd.f32 %v1437_v4, %v1428_v62 }
 0xd43   :  { %v1529_v15 = vadd.f32 %v1528_v14, %v1519_v9  ;;  %v1530_v27 = vadd.f32 %v1528_v14, %v1523_v8  ;;  %v1619_v30 = vadd.f32 %v1618_v35, %v1609_v63  ;;  %v1620_v42 = vadd.f32 %v1618_v35, %v1613_v33 }
 0xd44   :  { %v1441_v10 = vmul.f32 0.2, %v1439_v5  ;;  %v1353_v11 = vmul.f32 0.2, %v1351_v19  ;;  %v1354_v13 = vmul.f32 0.2, %v1352_v6 }
 0xd45   :  { %v1440_v21 = vmul.f32 0.2, %v1438_v7  ;;  %v1531_v26 = vmul.f32 0.2, %v1529_v15  ;;  %v1532_v47 = vmul.f32 0.2, %v1530_v27 }
 0xd46   :  { %v1443_v16 = vmax.f32 %v1439_v5, %v1441_v10  ;;  %v1355_v17 = vmax.f32 %v1351_v19, %v1353_v11  ;;  %v1356_v18 = vmax.f32 %v1352_v6, %v1354_v13  ;;  %v1621_v39 = vmul.f32 0.2, %v1619_v30 }
 0xd47   :  { %v1442_v25 = vmax.f32 %v1438_v7, %v1440_v21  ;;  %v1533_v29 = vmax.f32 %v1529_v15, %v1531_v26  ;;  %v1534_v37 = vmax.f32 %v1530_v27, %v1532_v47  ;;  %v1622_v46 = vmul.f32 0.2, %v1620_v42 }
 0xd48   :  { %v1445_v31 = vsel %vm59_vm4, %v1443_v16, -1e+30  ;;  %v1357_v32 = vsel %vm58_vm6, %v1355_v17, -1e+30  ;;  %v1358_v24 = vsel %vm59_vm4, %v1356_v18, -1e+30  ;;  %v1623_v45 = vmax.f32 %v1619_v30, %v1621_v39 }
 0xd49   :  { %v1449_v22 = vsel %vm235_vm5, %v1445_v31, -inf  ;;  %v1359_v23 = vsel %vm235_vm5, %v1357_v32, -inf  ;;  %v1362_v28 = vsel %vm235_vm5, %v1358_v24, -inf  ;;  %v1444_v12 = vsel %vm58_vm6, %v1442_v25, -1e+30 }
 0xd4a   :  { %1450 = vmax.xlane.f32.xlu1 %v1449_v22  ;;  %1360 = vmax.xlane.f32.xlu0 %v1359_v23  ;;  %v1446_v34 = vsel %vm235_vm5, %v1444_v12, -inf  ;;  %v1535_v36 = vsel %vm58_vm6, %v1533_v29, -1e+30  ;;  %v1536_v44 = vsel %vm59_vm4, %v1534_v37, -1e+30  ;;  %v1624_v49 = vmax.f32 %v1620_v42, %v1622_v46 }
 0xd4b   :  { %v1537_v43 = vsel %vm235_vm5, %v1535_v36, -inf  ;;  %v1540_v48 = vsel %vm235_vm5, %v1536_v44, -inf  ;;  %v1625_v38 = vsel %vm58_vm6, %v1623_v45, -1e+30 }
 0xd4c   :  { %v1627_v50 = vsel %vm235_vm5, %v1625_v38, -inf  ;;  %v1626_v51 = vsel %vm59_vm4, %v1624_v49, -1e+30 }
 0xd4d   :  { %v1630_v52 = vsel %vm235_vm5, %v1626_v51, -inf }
 0xd4e   :  { %1363 = vmax.xlane.f32.xlu0 %v1362_v28 }
 0xd52   :  { %1447 = vmax.xlane.f32.xlu0 %v1446_v34 }
 0xd56   :  { %1538 = vmax.xlane.f32.xlu0 %v1537_v43 }
 0xd5a   :  { %1541 = vmax.xlane.f32.xlu0 %v1540_v48 }
 0xd5b   :  { %1470 = vrot.lane.b32.xlu1 %v2686_v53, %s2334_s1 }
 0xd5e   :  { %1628 = vmax.xlane.f32.xlu0 %v1627_v50 }
 0xd62   :  { %1631 = vmax.xlane.f32.xlu0 %v1630_v52 }
 0xdd7   :  { %v1451_v54 = vpop.xlane.xlu1 %1450  ;;  %v1361_v55 = vpop.xlane.xlu0 %1360 }
 0xdd8   :  { %v1365_v56 = vsub.f32 %v1357_v32, %v1361_v55  ;;  %v1453_v61 = vsub.f32 %v1445_v31, %v1451_v54 }
 0xdda   :  { %v1367_v57 = vmul.f32 1.442695, %v1365_v56  ;;  %v1456_v0 = vmul.f32 1.442695, %v1453_v61 }
 0xddb   :  { %v1471_v58 = vpop.permute.xlu1 %1470  ;;  %v1364_v41 = vpop.xlane.xlu0 %1363 }
 0xddc   :  { %v1366_v59 = vsub.f32 %v1358_v24, %v1364_v41  ;;  %2113 = vmatpush3.bf16.msra.mxu1 %v1471_v58  ;;  %2271 = vpow2.f32 %v1367_v57 }
 0xddd   :  { %2124 = vmatprep.subr.bf16.mxu1 %v2327_v2 }
 0xdde   :  { %v1369_v60 = vmul.f32 1.442695, %v1366_v59 }
 0xddf   :  { %v1448_v62 = vpop.xlane.xlu0 %1447 }
 0xde0   :  { %2273 = vpow2.f32 %v1369_v60  ;;  %v1452_v40 = vsub.f32 %v1444_v12, %v1448_v62 }
 0xde2   :  { %v1454_v63 = vmul.f32 1.442695, %v1452_v40 }
 0xde3   :  { %v1539_v8 = vpop.xlane.xlu0 %1538 }
 0xde4   :  { %2275 = vpow2.f32 %v1454_v63  ;;  %v1543_v1 = vsub.f32 %v1535_v36, %v1539_v8 }
 0xde5   :  { %2277 = vpow2.f32 %v1456_v0 }
 0xde6   :  { %v2272_v3 = vpop.eup %2271  ;;  %v1545_v20 = vmul.f32 1.442695, %v1543_v1 }
 0xde7   :  { %v1542_v4 = vpop.xlane.xlu0 %1541  ;;  %v1371_v5 = vsel %vm235_vm5, %v2272_v3, 0.0 }
 0xde8   :  { %v1544_v14 = vsub.f32 %v1536_v44, %v1542_v4  ;;  %1372 = vadd.xlane.f32.xlu0 %v1371_v5  ;;  %2279 = vpow2.f32 %v1545_v20 }
 0xdea   :  { %v2274_v19 = vpop.eup %2273  ;;  %v1547_v6 = vmul.f32 1.442695, %v1544_v14 }
 0xdeb   :  { %v1629_v7 = vpop.xlane.xlu0 %1628  ;;  %v1374_v9 = vsel %vm235_vm5, %v2274_v19, 0.0 }
 0xdec   :  { %v1633_v10 = vsub.f32 %v1625_v38, %v1629_v7  ;;  %1375 = vadd.xlane.f32.xlu0 %v1374_v9  ;;  %2281 = vpow2.f32 %v1547_v6 }
 0xdee   :  { %v2276_v11 = vpop.eup %2275  ;;  %v1635_v13 = vmul.f32 1.442695, %v1633_v10  ;;  %v1748_v10 = vld [vmem:[%s2827_s11] sm:$0xff] }
 0xdef   :  { %v1632_v15 = vpop.xlane.xlu0 %1631  ;;  %v1458_v16 = vsel %vm235_vm5, %v2276_v11, 0.0  ;;  %v2278_v18 = vpop.eup %2277 }
 0xdf0   :  { %2283 = vpow2.f32 %v1635_v13  ;;  %v1634_v17 = vsub.f32 %v1626_v51, %v1632_v15  ;;  %1459 = vadd.xlane.f32.xlu0 %v1458_v16  ;;  %v1461_v31 = vsel %vm235_vm5, %v2278_v18, 0.0  ;;  %v2340_v15 = vmov 0.0|0.0   ;;  %v1750_v16 = vld [vmem:[%s2827_s11 + $0x10] sm:$0xff] }
 0xdf2   :  { %v1637_v21 = vmul.f32 1.442695, %v1634_v17  ;;  %v2280_v32 = vpop.eup %2279  ;;  %v1751_v17 = vld [vmem:[%s2827_s11 + $0x18] sm:$0xff] }
 0xdf3   :  { %v1549_v35 = vsel %vm235_vm5, %v2280_v32, 0.0 }
 0xdf4   :  { %2285 = vpow2.f32 %v1637_v21  ;;  %1462 = vadd.xlane.f32.xlu0 %v1461_v31  ;;  %v1827_v21 = vld [vmem:[%s2829_s13] sm:$0xff]  ;;  %v1828_v31 = vld [vmem:[%s2829_s13 + $0x8] sm:$0xff] }
 0xdf6   :  { %v2282_v22 = vpop.eup %2281 }
 0xdf7   :  { %v1552_v25 = vsel %vm235_vm5, %v2282_v22, 0.0 }
 0xdf8   :  { %1550 = vadd.xlane.f32.xlu0 %v1549_v35 }
 0xdfa   :  { %v2284_v23 = vpop.eup %2283 }
 0xdfb   :  { %v1639_v24 = vsel %vm235_vm5, %v2284_v23, 0.0 }
 0xdfc   :  { %1640 = vadd.xlane.f32.xlu1 %v1639_v24  ;;  %1553 = vadd.xlane.f32.xlu0 %v1552_v25 }
 0xdfe   :  { %v2286_v26 = vpop.eup %2285 }
 0xdff   :  { %v1642_v27 = vsel %vm235_vm5, %v2286_v26, 0.0 }
 0xe00   :  { %1643 = vadd.xlane.f32.xlu0 %v1642_v27 }
 0xe0d   :  { %1650 = vrot.lane.b32.xlu1 %v2686_v53, %s2335_s28 }
 0xe16   :  { %1560 = vrot.lane.b32.xlu0 %v2686_v53, %s2336_s29 }
 0xe75   :  { %v1373_v28 = vpop.xlane.xlu0 %1372 }
 0xe76   :  { %2287 = vrcp.f32 %v1373_v28 }
 0xe79   :  { %v1376_v12 = vpop.xlane.xlu0 %1375 }
 0xe7a   :  { %2289 = vrcp.f32 %v1376_v12 }
 0xe7d   :  { %v1460_v29 = vpop.xlane.xlu0 %1459 }
 0xe7e   :  { %2291 = vrcp.f32 %v1460_v29 }
 0xe80   :  { %v2288_v30 = vpop.eup %2287 }
 0xe81   :  { %v1463_v47 = vpop.xlane.xlu0 %1462  ;;  %v1379_v34 = vmul.f32 %v2288_v30, %v2272_v3 }
 0xe82   :  { %2293 = vrcp.f32 %v1463_v47 }
 0xe84   :  { %v2290_v33 = vpop.eup %2289 }
 0xe85   :  { %v1380_v36 = vmul.f32 %v2290_v33, %v2274_v19  ;;  %v1551_v37 = vpop.xlane.xlu0 %1550 }
 0xe86   :  { %2295 = vrcp.f32 %v1551_v37 }
 0xe87   :  { %v1381_v39 = vpack.c.bf16 %v1380_v36, %v1379_v34 }
 0xe88   :  { %v2292_v53 = vpop.eup %2291 }
 0xe89   :  { %v1641_v42 = vpop.xlane.xlu1 %1640  ;;  %2109 = vmatmul.mubr.msk.bf16.vlgmr.msra.gmra.mrb[28].mxu0 %vm235_vm5, %v1381_v39  ;;  %v1554_v43 = vpop.xlane.xlu0 %1553  ;;  %v1466_v45 = vmul.f32 %v2292_v53, %v2276_v11  ;;  %v1749_v11 = vld [vmem:[%s2827_s11 + $0x8] sm:$0xff] }
 0xe8a   :  { %2297 = vrcp.f32 %v1554_v43  ;;  %2120 = vmatprep.mubr.msk.bf16.mxu0 %vm2328_vm1, %v2327_v2  ;;  %v2151_v13 = vpack.c.bf16 %v1749_v11, %v1748_v10 }
 0xe8b   :  { %2299 = vrcp.f32 %v1641_v42 }
 0xe8c   :  { %v2294_v44 = vpop.eup %2293 }
 0xe8d   :  { %v1467_v46 = vmul.f32 %v2294_v44, %v2278_v18  ;;  %v1644_v48 = vpop.xlane.xlu0 %1643  ;;  %v1651_v49 = vpop.permute.xlu1 %1650  ;;  %v2154_v18 = vpack.c.bf16 %v1751_v17, %v1750_v16 }
 0xe8e   :  { %2301 = vrcp.f32 %v1644_v48 }
 0xe8f   :  { %v1468_v38 = vpack.c.bf16 %v1467_v46, %v1466_v45 }
 0xe90   :  { %v2296_v51 = vpop.eup %2295 }
 0xe91   :  { %2115 = vmatmul.mubr.msk.bf16.vlgmr.msra.gmra.mrb[28].mxu1 %vm235_vm5, %v1468_v38  ;;  %v1561_v50 = vpop.permute.xlu0 %1560  ;;  %v1557_v54 = vmul.f32 %v2296_v51, %v2280_v32  ;;  %v2157_v32 = vpack.c.bf16 %v1828_v31, %v1827_v21  ;;  %v1752_v51 = vld [vmem:[%s2828_s12] sm:$0x1]  ;;  %s2307_s12 = scalar_lea.vmem %s1917_s27, 32 }
 0xe92   :  { %2125 = vmatpush3.bf16.msra.mxu1 %v1651_v49  ;;  %2119 = vmatpush3.bf16.msra.mxu0 %v1561_v50  ;;  %v1829_v50 = vld [vmem:[%s2829_s13 + $0x10] sm:$0xf]  ;;  %s2303_s13 = scalar_lea.vmem %s1917_s27, 16 }
 0xe93   :  { %2126 = vmatprep.mubr.msk.bf16.mxu1 %vm2328_vm1, %v2327_v2  ;;  %2150 = vmatprep.subr.bf16.mxu0 %v2340_v15  ;;  %p2304_p0 = scmp.ne.s32.totalorder %s1917_s27, %s2303_s13  ;;  %p2309_p2 = scmp.lt.s32.totalorder %s2307_s12, %s2303_s13 }
 0xe94   :  { %v2298_v52 = vpop.eup %2297  ;;  %2156 = vmatprep.subr.bf16.mxu1 %v2340_v15 }
 0xe95   :  { %v1558_v55 = vmul.f32 %v2298_v52, %v2282_v22  ;;  %v2300_v56 = vpop.eup %2299  ;;  %p2310_p3 = por %p2309_p2, %p2308_p1 }
 0xe96   :  { %v1647_v41 = vmul.f32 %v2300_v56, %v2284_v23 }
 0xe97   :  { %v1559_v57 = vpack.c.bf16 %v1558_v55, %v1557_v54  ;;  %p2311_p4 = pnand %p2310_p3, %p2304_p0 }
 0xe98   :  { %v2302_v58 = vpop.eup %2301 }
 0xe99   :  { %v1648_v59 = vmul.f32 %v2302_v58, %v2286_v26  ;;  %2121 = vmatmul.mubr.msk.bf16.vlgmr.msra.gmra.mrb[32].mxu0 %vm235_vm5, %v1559_v57  ;;  %v1954_v26 = vld [vmem:[%s2826_s10] ss:$0 sm:$0xff] }
 0xe9a   :  { %2138 = vmatprep.mubr.msk.f32.mxu0 %vm2328_vm1, %v2327_v2  ;;  %2152 = vmatpush3.bf16.msra.mxu0 %v2151_v13  ;;  %v1830_v57 = vld [vmem:[%s2830_s14] sm:$0x1] }
 0xe9b   :  { %v1649_v60 = vpack.c.bf16 %v1648_v59, %v1647_v41  ;;  %2153 = vmatprep.subr.bf16.mxu0 %v2340_v15 }
 0xe9d   :  { %2127 = vmatmul.mubr.msk.bf16.vlgmr.msra.gmra.mrb[32].mxu1 %vm235_vm5, %v1649_v60 }
 0xe9e   :  { %2147 = vmatprep.mubr.msk.f32.mxu1 %vm2328_vm1, %v2327_v2  ;;  %2155 = vmatpush3.bf16.msra.mxu0 %v2154_v18 }
 0xe9f   :  { %2158 = vmatpush3.bf16.msra.mxu1 %v2157_v32 }
 0xea0   :  { %2145 = vmatprep.subr.mxu1 %v2327_v2 }
 0xea3   :  { %2146 = vmatpush3.msk.msra.mxu1 %vm68_vm0, %v1829_v50 }
 0xf5c   :  { %v1419_v61 = vpop.f32.mrb[28].mxu0 }
 0xf5d   :  { %v2110_v62 = vpop.f32.mrb[29].mxu0 }
 0xf5e   :  { %v1422_v40 = vpop.f32.mrb[30].mxu0 }
 0xf5f   :  { %v2111_v63 = vpop.f32.mrb[31].mxu0 }
 0xf64   :  { %v1510_v0 = vpop.f32.mrb[28].mxu1 }
 0xf65   :  { %1699 = vrot.lane.b32.xlu1 %v1510_v0, %s2337_s30  ;;  %v2116_v8 = vpop.f32.mrb[29].mxu1 }
 0xf66   :  { %v1513_v1 = vpop.f32.mrb[30].mxu1 }
 0xf67   :  { %1701 = vrot.lane.b32.xlu0 %v1513_v1, %s2337_s30  ;;  %v2117_v3 = vpop.f32.mrb[31].mxu1 }
 0xf6c   :  { %v1600_v20 = vpop.f32.mrb[32].mxu0 }
 0xf6d   :  { %1707 = vrot.lane.b32.xlu1 %v1600_v20, %s2338_s18  ;;  %v2122_v4 = vpop.f32.mrb[33].mxu0 }
 0xf6e   :  { %v1603_v14 = vpop.f32.mrb[34].mxu0 }
 0xf6f   :  { %1709 = vrot.lane.b32.xlu0 %v1603_v14, %s2338_s18  ;;  %v2123_v5 = vpop.f32.mrb[35].mxu0 }
 0xf70   :  { %v1690_v19 = vpop.f32.mrb[32].mxu1 }
 0xf71   :  { %v2128_v6 = vpop.f32.mrb[33].mxu1  ;;  %1715 = vrot.lane.b32.xlu1 %v1690_v19, %s2339_s23 }
 0xf72   :  { %v1693_v7 = vpop.f32.mrb[34].mxu1 }
 0xf73   :  { %v2129_v9 = vpop.f32.mrb[35].mxu1  ;;  %1717 = vrot.lane.b32.xlu0 %v1693_v7, %s2339_s23 }
 0xfd7   :  { %v1700_v35 = vpop.permute.xlu1 %1699 }
 0xfd8   :  { %v1721_v25 = vsel %vm64_vm2, %v1419_v61, %v1700_v35 }
 0xfd9   :  { %v1702_v22 = vpop.permute.xlu0 %1701 }
 0xfda   :  { %v1722_v12 = vsel %vm64_vm2, %v1422_v40, %v1702_v22 }
 0xfdf   :  { %v1708_v23 = vpop.permute.xlu1 %1707 }
 0xfe0   :  { %v1723_v27 = vsel %vm235_vm5, %v1721_v25, %v1708_v23 }
 0xfe1   :  { %v1710_v24 = vpop.permute.xlu0 %1709 }
 0xfe2   :  { %v1724_v47 = vsel %vm235_vm5, %v1722_v12, %v1710_v24 }
 0xfe3   :  { %v1716_v28 = vpop.permute.xlu1 %1715 }
 0xfe4   :  { %v1725_v29 = vsel %vm602_vm7, %v1723_v27, %v1716_v28 }
 0xfe5   :  { %v1734_v2 = vadd.f32 %v1954_v26, %v1725_v29  ;;  %v1718_v30 = vpop.permute.xlu0 %1717 }
 0xfe6   :  { %v1726_v33 = vsel %vm602_vm7, %v1724_v47, %v1718_v30 }
 0xfe7   :  { %v1736_v34 = vmax.f32 %v1734_v2, 0.0  ;;  %v1735_v36 = vadd.f32 %v1954_v26, %v1726_v33 }
 0xfe9   :  { %v1737_v37 = vmax.f32 %v1735_v36, 0.0  ;;  %v1738_v39 = vsel %vm130_vm3, %v1736_v34, 0.0 }
 0xfeb   :  { %v1739_v42 = vsel %vm130_vm3, %v1737_v37, 0.0 }
 0xfec   :  { %v1740_v43 = vadd.f32 %v1739_v42, %v1738_v39 }
 0xfee   :  { %v1741_v53 = vrot.slane %v1740_v43, 4 }
 0xff0   :  { %v1742_v44 = vadd.f32 %v1741_v53, %v1740_v43 }
 0xff2   :  { %v1743_v45 = vrot.slane %v1742_v44, 2 }
 0xff4   :  { %v1744_v46 = vadd.f32 %v1743_v45, %v1742_v44 }
 0xff6   :  { %v1745_v48 = vrot.slane %v1744_v46, 1 }
 0xff8   :  { %v1746_v38 = vadd.f32 %v1745_v48, %v1744_v46 }
 0xffa   :  { %v1747_v49 = vmul.f32 0.0625, %v1746_v38 }
 0xffc   :  { %2139 = vmatmul.mubr.msk.f32.vlgmr.msra.gmra.mrb[36].mxu0 %vm130_vm3, %v1747_v49 }
0x10cf   :  { %v1822_v52 = vpop.f32.mrb[36].mxu0 }
0x10d0   :  { %v1823_v54 = vadd.f32 %v1822_v52, %v1752_v51  ;;  %v2140_v55 = vpop.f32.mrb[37].mxu0 }
0x10d2   :  { %v1826_v56 = vmax.f32 %v1823_v54, 0.0 }
0x10d4   :  { %2148 = vmatmul.mubr.msk.f32.vlgmr.msra.gmra.mrb[36].mxu1 %vm1831_vm8, %v1826_v56 }
0x11a7   :  { %v1904_v58 = vpop.f32.mrb[36].mxu1 }
0x11a8   :  { %v1905_v41 = vadd.f32 %v1904_v58, %v1830_v57  ;;  %v2149_v59 = vpop.f32.mrb[37].mxu1 }
0x11aa   :  { %1909 = vst.msk [vmem:[#allocation2] sm:$0x1] %vm1908_vm9, %v1905_v41 }
0x11ab   :  { %2314 = shalt.err (!%p2311_p4)
}
0x11ac   :  { %s2315_s14 = scalar_lea.hbm %s2831_s15, 16 }
0x11ad   :  { %p2316_p5 = scmp.ne.s32.totalorder %s2831_s15, %s2315_s14  ;;  %p2319_p6 = scmp.lt.u32.totalorder %s2315_s14, %s2831_s15 }
0x11af   :  { %p2321_p7 = pnand %p2319_p6, %p2316_p5 }
0x11b1   :  { %2324 = shalt.err (!%p2321_p7)
}
0x11b2   :  { %1919 = dma.vmem_to_hbm [thread:$0]  %s1917_s27, 16, %s2831_s15, [#allocation3]  }
0x11b3   :  { %2325 = dma.done.wait [#allocation3], 16  }
0x11b4   :  { %2326 = vsyncadd [#allocation3], 4294967280 }
0x11b5   :  { %1923 = vsyncpa [#allocation3], 1 }

</bundles_post_ra>
